<compile_context>
chip_gen: v6e
topology: v6e:2x2x1
jax: 0.10.0
libtpu: 0.0.40
codegen_flags: <defaults>
</compile_context>

<pallas_src>
import functools

import jax
import jax.numpy as jnp
from jax.experimental import pallas as pl
from jax.experimental.pallas import tpu as pltpu


def se_kernel(x_ref, wrt_ref, br_ref, wet_ref, be_ref, o_ref, *, inv_hw):
    # x_ref : (Nb, C, HWp)  Nb batch samples, channels on sublanes, HW on lanes
    # wrt_ref: (C, Cs)      conv_reduce weight, pre-transposed
    # br_ref : (1, Cs)      conv_reduce bias
    # wet_ref: (Cs, C)      conv_expand weight, pre-transposed
    # be_ref : (1, C)       conv_expand bias
    # o_ref  : (Nb, C, HWp)
    x = x_ref[...]
    xf = x.astype(jnp.float32)                              # no-op for f32 input

    # Global average pool over spatial positions (lane reduction).
    # Sum then scale by 1/HW_true so zero-padded lanes don't bias the mean.
    pooled = jnp.sum(xf, axis=-1) * inv_hw                  # (Nb, C)

    # conv_reduce (1x1) + SiLU -- one batched matmul for all Nb samples.
    s = jnp.dot(pooled, wrt_ref[...],
                preferred_element_type=jnp.float32) + br_ref[...]   # (Nb, Cs)
    s = s * jax.nn.sigmoid(s)

    # conv_expand (1x1) + sigmoid gate.
    g = jnp.dot(s, wet_ref[...],
                preferred_element_type=jnp.float32) + be_ref[...]   # (Nb, C)
    g = jax.nn.sigmoid(g)

    # Broadcast the per-(sample, channel) gate over the lane (spatial) axis.
    o_ref[...] = (xf * g[:, :, None]).astype(o_ref.dtype)   # unmasked lane-dense store


def _pick_nb(N, per_sample_bytes, max_block_bytes):
    """Largest divisor of N such that the block stays under max_block_bytes
    and the grid keeps >= 2 steps (for v7x's two TensorCores)."""
    nb_cap = max(1, max_block_bytes // max(per_sample_bytes, 1))
    nb_cap = min(nb_cap, N)
    if N >= 2:
        nb_cap = min(nb_cap, max(1, N // 2))    # keep at least 2 grid steps
    for nb in range(nb_cap, 0, -1):
        if N % nb == 0:
            return nb
    return 1


def squeeze_excite(x_nchw, w_reduce, b_reduce, w_expand, b_expand):
    """x_nchw: (N, C, H, W) f32/bf16; weights in PyTorch Conv2d layouts.

    w_reduce: (Cs, C, 1, 1), b_reduce: (Cs,)
    w_expand: (C, Cs, 1, 1), b_expand: (C,)
    Returns (N, C, H, W) in the dtype of x_nchw.
    """
    N, C, H, W = x_nchw.shape
    Cs = w_reduce.shape[0]
    HW = H * W
    itemsize = jnp.dtype(x_nchw.dtype).itemsize

    # Free metadata reshape: NCHW stays contiguous, H*W lands on the lane axis.
    x = x_nchw.reshape(N, C, HW)

    # Keep the stored last dim a multiple of 128 (lane-dense, unmasked stores).
    HWp = ((HW + 127) // 128) * 128
    if HWp != HW:
        x = jnp.pad(x, ((0, 0), (0, 0), (0, HWp - HW)))

    # Weights pre-transposed so the in-kernel matmuls are (Nb,C)@(C,Cs) and
    # (Nb,Cs)@(Cs,C) with no transposes / per-sample N=1 matmuls.
    wrt = w_reduce[:, :, 0, 0].astype(jnp.float32).T        # (C, Cs)
    br = b_reduce.reshape(1, Cs).astype(jnp.float32)
    wet = w_expand[:, :, 0, 0].astype(jnp.float32).T        # (Cs, C)
    be = b_expand.reshape(1, C).astype(jnp.float32)

    # Batch Nb samples per grid step: target <= 4 MiB per x block so the
    # double-buffered x+out working set (4x) stays <= ~16 MiB - comfortably
    # inside v7x's 64-MiB physical VMEM and cheap to raise on v5e/v6e.
    per_sample_bytes = C * HWp * itemsize
    Nb = _pick_nb(N, per_sample_bytes, max_block_bytes=4 << 20)
    grid = (N // Nb,)

    block_bytes = Nb * per_sample_bytes
    weight_bytes = (2 * C * Cs + C + Cs) * 4
    vmem_bytes = 4 * block_bytes + 2 * weight_bytes + (4 << 20)

    # Advisory cost estimate (kernel is tiny & memory-bound).
    flops = 2 * N * C * HW + 4 * N * C * Cs
    transcendentals = N * (C + Cs)
    bytes_accessed = 2 * N * C * HWp * itemsize + weight_bytes

    kernel = functools.partial(se_kernel, inv_hw=1.0 / float(HW))

    out = pl.pallas_call(
        kernel,
        out_shape=jax.ShapeDtypeStruct((N, C, HWp), x.dtype),
        grid=grid,
        in_specs=[
            pl.BlockSpec((Nb, C, HWp), lambda n: (n, 0, 0)),   # x: Nb samples
            pl.BlockSpec((C, Cs), lambda n: (0, 0)),           # wrt
            pl.BlockSpec((1, Cs), lambda n: (0, 0)),           # br
            pl.BlockSpec((Cs, C), lambda n: (0, 0)),           # wet
            pl.BlockSpec((1, C), lambda n: (0, 0)),            # be
        ],
        out_specs=pl.BlockSpec((Nb, C, HWp), lambda n: (n, 0, 0)),
        compiler_params=pltpu.CompilerParams(
            dimension_semantics=("parallel",),
            vmem_limit_bytes=vmem_bytes),
        cost_estimate=pl.CostEstimate(
            flops=flops,
            transcendentals=transcendentals,
            bytes_accessed=bytes_accessed),
    )(x, wrt, br, wet, be)

    if HWp != HW:
        out = out[:, :, :HW]
    return out.reshape(N, C, H, W)


def _reference(x, w_reduce, b_reduce, w_expand, b_expand):
    """Pure-JAX reference mirroring the PyTorch forward (NCHW, 1x1 convs)."""
    def conv1x1(t, w, b):
        y = jax.lax.conv_general_dilated(
            t, w, window_strides=(1, 1), padding="VALID",
            dimension_numbers=("NCHW", "OIHW", "NCHW"))
        return y + b.reshape(1, -1, 1, 1)

    scale = jnp.mean(x, axis=(2, 3), keepdims=True)
    scale = conv1x1(scale, w_reduce, b_reduce)
    scale = scale * jax.nn.sigmoid(scale)                    # SiLU
    scale = conv1x1(scale, w_expand, b_expand)
    scale = jax.nn.sigmoid(scale)
    return scale * x


if __name__ == "__main__":
    # EfficientNetV2-style SE block: input_c=32, expand_ratio=4 -> expand_c=128,
    # se_ratio=0.25 -> squeeze_c=8.  The SE input x has expand_c channels.
    input_c, se_ratio = 32, 0.25
    expand_c = input_c * 4
    squeeze_c = int(input_c * se_ratio)

    key = jax.random.PRNGKey(0)
    ks = jax.random.split(key, 6)

    w_reduce = jax.random.normal(ks[1], (squeeze_c, expand_c, 1, 1), jnp.float32) * 0.1
    b_reduce = jax.random.normal(ks[2], (squeeze_c,), jnp.float32) * 0.1
    w_expand = jax.random.normal(ks[3], (expand_c, squeeze_c, 1, 1), jnp.float32) * 0.1
    b_expand = jax.random.normal(ks[4], (expand_c,), jnp.float32) * 0.1

    # Case 1: HW = 256 (multiple of 128), N = 8 -> Nb = 4, grid = (2,).
    N1, H1, W1 = 8, 16, 16
    x1 = jax.random.normal(ks[0], (N1, expand_c, H1, W1), jnp.float32)
    out1 = jax.block_until_ready(
        squeeze_excite(x1, w_reduce, b_reduce, w_expand, b_expand))
    ref1 = jax.block_until_ready(
        _reference(x1, w_reduce, b_reduce, w_expand, b_expand))
    assert out1.shape == (N1, expand_c, H1, W1)
    err1 = jnp.max(jnp.abs(out1 - ref1))
    assert jnp.allclose(out1, ref1, atol=1e-5, rtol=1e-5), f"max abs err {err1}"

    # Case 2: HW = 196 (not a multiple of 128) -> lane-padded to 256 in wrapper.
    N2, H2, W2 = 4, 14, 14
    x2 = jax.random.normal(ks[5], (N2, expand_c, H2, W2), jnp.float32)
    out2 = jax.block_until_ready(
        squeeze_excite(x2, w_reduce, b_reduce, w_expand, b_expand))
    ref2 = jax.block_until_ready(
        _reference(x2, w_reduce, b_reduce, w_expand, b_expand))
    assert out2.shape == (N2, expand_c, H2, W2)
    err2 = jnp.max(jnp.abs(out2 - ref2))
    assert jnp.allclose(out2, ref2, atol=1e-5, rtol=1e-5), f"max abs err {err2}"

    print("KERNEL_OK")
</pallas_src>

<mosaic_0001>
module attributes {stable_mosaic.version = 11 : i64} {
  func.func @se_kernel(%arg0: i32, %arg1: memref<4x128x256xf32, #tpu.memory_space<vmem>>, %arg2: memref<128x8xf32, #tpu.memory_space<vmem>>, %arg3: memref<1x8xf32, #tpu.memory_space<vmem>>, %arg4: memref<8x128xf32, #tpu.memory_space<vmem>>, %arg5: memref<1x128xf32, #tpu.memory_space<vmem>>, %arg6: memref<4x128x256xf32, #tpu.memory_space<vmem>>) attributes {dimension_semantics = [#tpu.dimension_semantics<parallel>], iteration_bounds = array<i64: 2>, scalar_prefetch = 0 : i64, scratch_operands = 0 : i64, tpu.core_type = #tpu.core_type<tc>, window_params = [{transform_indices = @transform_0, window_bounds = array<i64: 4, 128, 256>}, {pipeline_mode = #tpu.pipeline_mode<synchronous>, transform_indices = @transform_1, window_bounds = array<i64: 128, 8>}, {pipeline_mode = #tpu.pipeline_mode<synchronous>, transform_indices = @transform_2, window_bounds = array<i64: 1, 8>}, {pipeline_mode = #tpu.pipeline_mode<synchronous>, transform_indices = @transform_3, window_bounds = array<i64: 8, 128>}, {pipeline_mode = #tpu.pipeline_mode<synchronous>, transform_indices = @transform_4, window_bounds = array<i64: 1, 128>}, {transform_indices = @transform_5, window_bounds = array<i64: 4, 128, 256>}]} {
    %c0 = arith.constant 0 : index
    %c0_0 = arith.constant 0 : index
    %c0_1 = arith.constant 0 : index
    %0 = vector.load %arg1[%c0, %c0_0, %c0_1] : memref<4x128x256xf32, #tpu.memory_space<vmem>>, vector<4x128x256xf32>
    %cst = arith.constant dense<0.000000e+00> : vector<4x128xf32>
    %1 = vector.multi_reduction <add>, %0, %cst [2] : vector<4x128x256xf32> to vector<4x128xf32>
    %cst_2 = arith.constant 3.906250e-03 : f32
    %2 = vector.broadcast %cst_2 : f32 to vector<4x128xf32>
    %3 = arith.mulf %1, %2 : vector<4x128xf32>
    %c0_3 = arith.constant 0 : index
    %c0_4 = arith.constant 0 : index
    %4 = vector.load %arg2[%c0_3, %c0_4] : memref<128x8xf32, #tpu.memory_space<vmem>>, vector<128x8xf32>
    %cst_5 = arith.constant dense<0.000000e+00> : vector<4x8xf32>
    %5 = tpu.matmul %3, %4, %cst_5 {dimension_numbers = #tpu.dot_dimension_numbers<[1], [0], [0], [1], [0, 0, 1, 1], [], []>} : vector<4x128xf32>, vector<128x8xf32>, vector<4x8xf32> -> vector<4x8xf32>
    %c0_6 = arith.constant 0 : index
    %c0_7 = arith.constant 0 : index
    %6 = vector.load %arg3[%c0_6, %c0_7] : memref<1x8xf32, #tpu.memory_space<vmem>>, vector<1x8xf32>
    %7 = vector.broadcast %6 : vector<1x8xf32> to vector<4x8xf32>
    %8 = arith.addf %5, %7 : vector<4x8xf32>
    %9 = arith.negf %8 : vector<4x8xf32>
    %10 = math.exp %9 : vector<4x8xf32>
    %cst_8 = arith.constant 1.000000e+00 : f32
    %11 = vector.broadcast %cst_8 : f32 to vector<4x8xf32>
    %12 = arith.addf %11, %10 : vector<4x8xf32>
    %13 = arith.divf %11, %12 : vector<4x8xf32>
    %14 = arith.mulf %8, %13 : vector<4x8xf32>
    %c0_9 = arith.constant 0 : index
    %c0_10 = arith.constant 0 : index
    %15 = vector.load %arg4[%c0_9, %c0_10] : memref<8x128xf32, #tpu.memory_space<vmem>>, vector<8x128xf32>
    %cst_11 = arith.constant dense<0.000000e+00> : vector<4x128xf32>
    %16 = tpu.matmul %14, %15, %cst_11 {dimension_numbers = #tpu.dot_dimension_numbers<[1], [0], [0], [1], [0, 0, 1, 1], [], []>} : vector<4x8xf32>, vector<8x128xf32>, vector<4x128xf32> -> vector<4x128xf32>
    %c0_12 = arith.constant 0 : index
    %c0_13 = arith.constant 0 : index
    %17 = vector.load %arg5[%c0_12, %c0_13] : memref<1x128xf32, #tpu.memory_space<vmem>>, vector<1x128xf32>
    %18 = vector.broadcast %17 : vector<1x128xf32> to vector<4x128xf32>
    %19 = arith.addf %16, %18 : vector<4x128xf32>
    %20 = arith.negf %19 : vector<4x128xf32>
    %21 = math.exp %20 : vector<4x128xf32>
    %cst_14 = arith.constant 1.000000e+00 : f32
    %22 = vector.broadcast %cst_14 : f32 to vector<4x128xf32>
    %23 = arith.addf %22, %21 : vector<4x128xf32>
    %24 = arith.divf %22, %23 : vector<4x128xf32>
    %25 = vector.shape_cast %24 : vector<4x128xf32> to vector<4x128x1xf32>
    %26 = vector.broadcast %25 : vector<4x128x1xf32> to vector<4x128x256xf32>
    %27 = arith.mulf %0, %26 : vector<4x128x256xf32>
    %c0_15 = arith.constant 0 : index
    %c0_16 = arith.constant 0 : index
    %c0_17 = arith.constant 0 : index
    %28 = vector.load %arg6[%c0_15, %c0_16, %c0_17] : memref<4x128x256xf32, #tpu.memory_space<vmem>>, vector<4x128x256xf32>
    tpu.vector_store %arg6[%c0_15, %c0_16, %c0_17], %27 {strides = array<i32>} : memref<4x128x256xf32, #tpu.memory_space<vmem>>, vector<4x128x256xf32>,
    return
  }
  func.func @transform_0(%arg0: i32) -> (i32, i32, i32) {
    %c0_i32 = arith.constant 0 : i32
    %c0_i32_0 = arith.constant 0 : i32
    %c0_i32_1 = arith.constant 0 : i32
    return %arg0, %c0_i32, %c0_i32_0 : i32, i32, i32
  }
  func.func @transform_1(%arg0: i32) -> (i32, i32) {
    %c0_i32 = arith.constant 0 : i32
    %c0_i32_0 = arith.constant 0 : i32
    %c0_i32_1 = arith.constant 0 : i32
    return %c0_i32, %c0_i32_0 : i32, i32
  }
  func.func @transform_2(%arg0: i32) -> (i32, i32) {
    %c0_i32 = arith.constant 0 : i32
    %c0_i32_0 = arith.constant 0 : i32
    %c0_i32_1 = arith.constant 0 : i32
    return %c0_i32, %c0_i32_0 : i32, i32
  }
  func.func @transform_3(%arg0: i32) -> (i32, i32) {
    %c0_i32 = arith.constant 0 : i32
    %c0_i32_0 = arith.constant 0 : i32
    %c0_i32_1 = arith.constant 0 : i32
    return %c0_i32, %c0_i32_0 : i32, i32
  }
  func.func @transform_4(%arg0: i32) -> (i32, i32) {
    %c0_i32 = arith.constant 0 : i32
    %c0_i32_0 = arith.constant 0 : i32
    %c0_i32_1 = arith.constant 0 : i32
    return %c0_i32, %c0_i32_0 : i32, i32
  }
  func.func @transform_5(%arg0: i32) -> (i32, i32, i32) {
    %c0_i32 = arith.constant 0 : i32
    %c0_i32_0 = arith.constant 0 : i32
    %c0_i32_1 = arith.constant 0 : i32
    return %arg0, %c0_i32, %c0_i32_0 : i32, i32, i32
  }
}

</mosaic_0001>

<bundles_post_ra>
// kernel: tpu_custom_call.1
= control target key start
LH: loop header
LB: loop body
LE: loop exit
PB: predicated region body
PF: predicated region fallthrough
CT: control target
= control target key end

     0   :  { %10 = vsyncpa [#allocation3], 0  ;;  %s3236_s0 = inlined_call_operand.hbm [shape: f32[8,128,256], index: 0, kind: input, shape index: {}]   ;;  %s3237_s1 = inlined_call_operand.vmem [shape: f32[128,8], index: 1, kind: input, shape index: {}]   ;;  %s3238_s2 = inlined_call_operand.vmem [shape: f32[1,8], index: 2, kind: input, shape index: {}]   ;;  %s3239_s3 = inlined_call_operand.vmem [shape: f32[8,128], index: 3, kind: input, shape index: {}]   ;;  %s3240_s4 = inlined_call_operand.vmem [shape: f32[1,128], index: 4, kind: input, shape index: {}]   ;;  %s3241_s5 = inlined_call_operand.hbm [shape: f32[8,128,256], index: 5, kind: output, shape index: {}]  }
   0x1   :  { %12 = vsyncpa [#allocation3 + $0x1], 0 }
   0x2   :  { %13 = vsyncpa [#allocation4], 0 }
   0x3   :  { %15 = vsyncpa [#allocation4 + $0x1], 0  ;;  %s2253_s18 = smov 0   ;;  %s2255_s19 = smov 0  }
   0x4   :  { %s2257_s20 = smov 0   ;;  %s2259_s21 = smov 0  }
   0x5 LB: > { %s2274_s22 = sadd.s32 4294967295, %s2213_s21   ;;  %s1849_s23 = sadd.s32 4294967294, %s2213_s21   ;;  %s2213_s21 = sphi %s2259_s21, %s3277_s21   ;;  %s2209_s20 = sphi %s2257_s20, %s3276_s20   ;;  %s2205_s19 = sphi %s2255_s19, %s3275_s19   ;;  %s2201_s18 = sphi %s2253_s18, %s3274_s18  }
   0x6   : > { %s2278_s24 = sadd.s32 1, %s2213_s21   ;;  %s28_s25 = sadd.s32 1, %s2209_s20 }
   0x7   : > { %s25_s26 = ssub.s32 %s2213_s21, %s2278_s24  ;;  %p35_p0 = scmp.ne.s32.totalorder %s2209_s20, %s2205_s19 }
   0x8   : > { %p26_p1 = scmp.eq.s32.totalorder %s25_s26, 0  ;;  %p36_p2 = scmp.eq.s32.totalorder %s2213_s21, 0 }
   0x9   : > { %p41_p3 = scmp.ne.s32.totalorder %s2205_s19, %s2201_s18  ;;  %p42_p4 = scmp.eq.s32.totalorder %s2274_s22, 0 }
   0xa   : > { %s2290_s27 = scalar_select %p26_p1, %s2209_s20, %s28_s25  }
   0xb   : > { %p2292_p5 = por %p36_p2, %p35_p0  ;;  %p2296_p6 = por %p42_p4, %p41_p3 }
   0xc   : > { %p149_p7 = scmp.eq.s32.totalorder %s2274_s22, 1  ;;  %p155_p8 = scmp.eq.s32.totalorder %s1849_s23, 1 }
   0xd   : > { %s3250_s29 = scalar_select %p2296_p6, 1, 0 }
   0xe   : > { %p1945_p10 = scmp.lt.s32.totalorder %s2213_s21, 2  ;;  %p2303_p11 = por %p149_p7, %p35_p0 }
   0xf   : > { %p2307_p12 = por %p155_p8, %p41_p3  ;;  %s187_s7 = sand.u32 1, %s2209_s20  }
  0x10   : > { %s3251_s30 = scalar_select %p2303_p11, 1, 0 }
  0x11   : > { %s3252_s6 = scalar_select %p2307_p12, 1, 0 }
  0x12   : > { %s1871_s8 = sshll.u32 %s2213_s21, 14  ;;  %s1852_s9 = sshll.u32 %s187_s7, 10 }
  0x13   : > { %s2316_s12 = scalar_lea.hbm %s3236_s0, %s1871_s8  ;;  %s191_s13 = scalar_lea.vmem [#allocation2], %s1852_s9 }
  0x14   : > { %s199_s14 = sshll.u32 %s191_s13, 4  ;;  %p2320_p13 = pnand %p1945_p10, %p2292_p5  ;;  %s2324_s14 = int_to_ptr.vmem [resolvable:$true] %s199_s14 }
  0x15   : > { %s2326_s16 = scalar_lea.sflag [#allocation3], %s187_s7  ;;  %s2121_s17 = scalar_lea.hbm %s2316_s12, 16384 }
  0x16   : > { %p2122_p0 = scmp.ne.s32.totalorder %s2316_s12, %s2121_s17  ;;  %p2123_p1 = pneg %p2320_p13 }
  0x17   : > { %s2126_s26 = scalar_lea.hbm %s3236_s0, 32768  ;;  %p2127_p4 = scmp.lt.s32.totalorder %s2316_s12, %s3236_s0 }
  0x18   : > { %p2124_p2 = pnand %p2123_p1, %p2122_p0  ;;  %p2128_p5 = scmp.lt.s32.totalorder %s2126_s26, %s2121_s17 }
  0x1a   : > { %p2125_p3 = pneg %p2124_p2  ;;  %p2129_p7 = por %p2128_p5, %p2127_p4 }
  0x1c   : > { %p2130_p8 = pnand %p2129_p7, %p2125_p3 }
  0x1e   : > { %2133 = shalt.err (!%p2130_p8)
}
  0x1f   : > { %s2134_s7 = scalar_lea.vmem %s2324_s14, 16384  ;;  %s2215_s9 = smov [#allocation2]  }
  0x20   : > { %p2135_p10 = scmp.ne.s32.totalorder %s2324_s14, %s2134_s7  ;;  %s2139_s10 = sshll.u32 %s2215_s9, 4  ;;  %s2140_s10 = int_to_ptr.vmem [resolvable:$false] %s2139_s10 }
  0x21   : > { %s2141_s11 = scalar_lea.vmem %s2140_s10, 32768  ;;  %p2142_p2 = scmp.lt.s32.totalorder %s2324_s14, %s2140_s10 }
  0x22   : > { %p2137_p9 = pnand %p2135_p10, %p2123_p1  ;;  %p2143_p12 = scmp.lt.s32.totalorder %s2141_s11, %s2134_s7 }
  0x24   : > { %p2138_p0 = pneg %p2137_p9  ;;  %p2144_p11 = por %p2143_p12, %p2142_p2 }
  0x26   : > { %p2145_p6 = pnand %p2144_p11, %p2138_p0 }
  0x28   : > { %2148 = shalt.err (!%p2145_p6)
}
  0x29   : > { %s2216_s13 = smov 256   ;;  %s2217_s17 = smov 16  }
  0x2a   : > { %1940 = dma.hbm_to_vmem [thread:$0]  (!%p2320_p13), %s2316_s12, 16384, %s2324_s14, %s2326_s16, %s2216_s13, %s2216_s13, %s2217_s17  }
  0x2b   : > { %p1856_p9 = scmp.ge.s32.totalorder %s2213_s21, 1  ;;  %p207_p1 = scmp.lt.s32.totalorder %s2213_s21, 3 }
  0x2d   : > { %p208_p3 = pnand %p1856_p9, %p207_p1 }
  0x2f   : > { %211 = sbr.rel (%p208_p3) target bundleno = 1046 (0x416), region = 40 }
  0x34   : > { %s2350_s23 = sand.u32 1, %s2205_s19   ;;  %p3254_p6 = scmp.ne.s32.totalorder %s3250_s29, 0 }
  0x35   : > { %s1857_s25 = sshll.u32 %s2350_s23, 10  ;;  %s214_s26 = scalar_lea.sflag [#allocation3], %s2350_s23 }
  0x36   : > { %s2356_s28 = scalar_lea.vmem [#allocation2], %s1857_s25 }
  0x37   : > { %2192 = dma.done.wait (%p3254_p6), %s214_s26, 16384  }
  0x38   : > { %2194 = vsyncadd (%p3254_p6), %s214_s26, 4294950912  ;;  %v278_v0 = vld [vmem:[%s2356_s28 + $0x100] sm:$0xff]  ;;  %v279_v1 = vld [vmem:[%s2356_s28 + $0x108] sm:$0xff]  ;;  %vm2219_vm0 = vmmov 0   ;;  %vm728_vm1 = vcmask 130112   ;;  %vm735_vm2 = vcmask 195712  }
  0x39   : > { %v246_v2 = vld [vmem:[%s2356_s28] sm:$0xff]  ;;  %v422_v3 = vadd.f32 %v279_v1, %v278_v0  ;;  %v247_v4 = vld [vmem:[%s2356_s28 + $0x8] sm:$0xff]  ;;  %v280_v5 = vld [vmem:[%s2356_s28 + $0x110] sm:$0xff]  ;;  %vm742_vm3 = vcmask 261312   ;;  %vm749_vm4 = vcmask 326912   ;;  %vm756_vm5 = vcmask 392512  }
  0x3a   : > { %v281_v6 = vld [vmem:[%s2356_s28 + $0x118] sm:$0xff]  ;;  %v374_v7 = vadd.f32 %v247_v4, %v246_v2  ;;  %v248_v8 = vld [vmem:[%s2356_s28 + $0x10] sm:$0xff]  ;;  %v282_v12 = vld [vmem:[%s2356_s28 + $0x120] sm:$0xff]  ;;  %vm763_vm6 = vcmask 458112   ;;  %vm770_vm7 = vcmask 523712   ;;  %vm777_vm8 = vcmask 589312  }
  0x3b   : > { %v249_v9 = vld [vmem:[%s2356_s28 + $0x18] sm:$0xff]  ;;  %423 = vadd.xlane.f32.xlu1 %v422_v3  ;;  %v425_v10 = vadd.f32 %v281_v6, %v280_v5  ;;  %v283_v13 = vld [vmem:[%s2356_s28 + $0x128] sm:$0xff]  ;;  %v250_v14 = vld [vmem:[%s2356_s28 + $0x20] sm:$0xff]  ;;  %vm784_vm9 = vcmask 654912   ;;  %vm791_vm10 = vcmask 720512   ;;  %vm798_vm11 = vcmask 786112  }
  0x3c   : > { %375 = vadd.xlane.f32.xlu0 %v374_v7  ;;  %v377_v11 = vadd.f32 %v249_v9, %v248_v8  ;;  %v251_v15 = vld [vmem:[%s2356_s28 + $0x28] sm:$0xff]  ;;  %v428_v16 = vadd.f32 %v283_v13, %v282_v12  ;;  %v312_v18 = vld [vmem:[%s2356_s28 + $0x210] sm:$0xff]  ;;  %v313_v19 = vld [vmem:[%s2356_s28 + $0x218] sm:$0xff]  ;;  %vm805_vm12 = vcmask 851712   ;;  %vm812_vm13 = vcmask 917312   ;;  %s2928_s26 = scalar_lea.vmem [#allocation5], %s1857_s25 }
  0x3d   : > { %v380_v17 = vadd.f32 %v251_v15, %v250_v14  ;;  %v310_v20 = vld [vmem:[%s2356_s28 + $0x200] sm:$0xff]  ;;  %v311_v21 = vld [vmem:[%s2356_s28 + $0x208] sm:$0xff]  ;;  %v473_v22 = vadd.f32 %v313_v19, %v312_v18  ;;  %v284_v24 = vld [vmem:[%s2356_s28 + $0x130] sm:$0xff]  ;;  %vm819_vm14 = vcmask 982912   ;;  %vm826_vm15 = vcmask 1048512   ;;  %s1873_s25 = sshll.u32 %s2274_s22, 14 }
  0x3e   : > { %v470_v23 = vadd.f32 %v311_v21, %v310_v20  ;;  %v285_v25 = vld [vmem:[%s2356_s28 + $0x138] sm:$0xff]  ;;  %v252_v26 = vld [vmem:[%s2356_s28 + $0x30] sm:$0xff]  ;;  %v342_v30 = vld [vmem:[%s2356_s28 + $0x300] sm:$0xff]  ;;  %s1776_s29 = sshll.u32 %s2928_s26, 4  ;;  %s3187_s15 = scalar_lea.hbm %s3241_s5, %s1873_s25  ;;  %s3189_s29 = int_to_ptr.vmem [resolvable:$true] %s1776_s29 }
  0x3f   : > { %426 = vadd.xlane.f32.xlu1 %v425_v10  ;;  %v253_v27 = vld [vmem:[%s2356_s28 + $0x38] sm:$0xff]  ;;  %v431_v28 = vadd.f32 %v285_v25, %v284_v24  ;;  %v343_v31 = vld [vmem:[%s2356_s28 + $0x308] sm:$0xff]  ;;  %v314_v32 = vld [vmem:[%s2356_s28 + $0x220] sm:$0xff]  ;;  %s1762_s22 = scalar_lea.sflag [#allocation4], %s2350_s23  ;;  %s2149_s16 = scalar_lea.vmem %s3189_s29, 16384 }
  0x40   : > { %378 = vadd.xlane.f32.xlu0 %v377_v11  ;;  %v383_v29 = vadd.f32 %v253_v27, %v252_v26  ;;  %v315_v33 = vld [vmem:[%s2356_s28 + $0x228] sm:$0xff]  ;;  %v518_v34 = vadd.f32 %v343_v31, %v342_v30  ;;  %v254_v36 = vld [vmem:[%s2356_s28 + $0x40] sm:$0xff]  ;;  %v344_v38 = vld [vmem:[%s2356_s28 + $0x310] sm:$0xff]  ;;  %p2150_p11 = scmp.ne.s32.totalorder %s3189_s29, %s2149_s16  ;;  %p3271_p12 = scmp.ne.s32.totalorder %s3251_s30, 0 }
  0x41   : > { %v476_v35 = vadd.f32 %v315_v33, %v314_v32  ;;  %v255_v37 = vld [vmem:[%s2356_s28 + $0x48] sm:$0xff]  ;;  %v345_v39 = vld [vmem:[%s2356_s28 + $0x318] sm:$0xff]  ;;  %v316_v42 = vld [vmem:[%s2356_s28 + $0x230] sm:$0xff]  ;;  %s2220_s8 = smov [#allocation5]  }
  0x42   : > { %v386_v40 = vadd.f32 %v255_v37, %v254_v36  ;;  %v521_v41 = vadd.f32 %v345_v39, %v344_v38  ;;  %v317_v43 = vld [vmem:[%s2356_s28 + $0x238] sm:$0xff]  ;;  %v286_v44 = vld [vmem:[%s2356_s28 + $0x140] sm:$0xff]  ;;  %v287_v45 = vld [vmem:[%s2356_s28 + $0x148] sm:$0xff]  ;;  %p2151_p13 = pnand %p2150_p11, %p3271_p12  ;;  %s2153_s7 = sshll.u32 %s2220_s8, 4  ;;  %s2154_s7 = int_to_ptr.vmem [resolvable:$false] %s2153_s7 }
  0x43   : > { %429 = vadd.xlane.f32.xlu1 %v428_v16  ;;  %v479_v46 = vadd.f32 %v317_v43, %v316_v42  ;;  %v434_v47 = vadd.f32 %v287_v45, %v286_v44  ;;  %v256_v48 = vld [vmem:[%s2356_s28 + $0x50] sm:$0xff]  ;;  %v257_v49 = vld [vmem:[%s2356_s28 + $0x58] sm:$0xff]  ;;  %v346_v50 = vld [vmem:[%s2356_s28 + $0x320] sm:$0xff]  ;;  %s2155_s9 = scalar_lea.vmem %s2154_s7, 32768  ;;  %p2156_p5 = scmp.lt.s32.totalorder %s3189_s29, %s2154_s7 }
  0x44   : > { %381 = vadd.xlane.f32.xlu0 %v380_v17  ;;  %v347_v51 = vld [vmem:[%s2356_s28 + $0x328] sm:$0xff]  ;;  %v389_v52 = vadd.f32 %v257_v49, %v256_v48  ;;  %v318_v54 = vld [vmem:[%s2356_s28 + $0x240] sm:$0xff]  ;;  %v288_v56 = vld [vmem:[%s2356_s28 + $0x150] sm:$0xff]  ;;  %p2152_p4 = pneg %p2151_p13  ;;  %p2157_p7 = scmp.lt.s32.totalorder %s2155_s9, %s2149_s16 }
  0x45   : > { %v524_v53 = vadd.f32 %v347_v51, %v346_v50  ;;  %v319_v55 = vld [vmem:[%s2356_s28 + $0x248] sm:$0xff]  ;;  %v289_v57 = vld [vmem:[%s2356_s28 + $0x158] sm:$0xff]  ;;  %v258_v60 = vld [vmem:[%s2356_s28 + $0x60] sm:$0xff] }
  0x46   : > { %v482_v58 = vadd.f32 %v319_v55, %v318_v54  ;;  %v437_v59 = vadd.f32 %v289_v57, %v288_v56  ;;  %v259_v61 = vld [vmem:[%s2356_s28 + $0x68] sm:$0xff]  ;;  %v348_v62 = vld [vmem:[%s2356_s28 + $0x330] sm:$0xff]  ;;  %v349_v63 = vld [vmem:[%s2356_s28 + $0x338] sm:$0xff]  ;;  %p2158_p8 = por %p2157_p7, %p2156_p5 }
  0x47   : > { %474 = vadd.xlane.f32.xlu1 %v473_v22  ;;  %v392_v0 = vadd.f32 %v259_v61, %v258_v60  ;;  %v527_v1 = vadd.f32 %v349_v63, %v348_v62  ;;  %v320_v2 = vld [vmem:[%s2356_s28 + $0x250] sm:$0xff]  ;;  %v321_v3 = vld [vmem:[%s2356_s28 + $0x258] sm:$0xff]  ;;  %v290_v4 = vld [vmem:[%s2356_s28 + $0x160] sm:$0xff] }
  0x48   : > { %471 = vadd.xlane.f32.xlu0 %v470_v23  ;;  %v291_v5 = vld [vmem:[%s2356_s28 + $0x168] sm:$0xff]  ;;  %v485_v6 = vadd.f32 %v321_v3, %v320_v2  ;;  %v260_v8 = vld [vmem:[%s2356_s28 + $0x70] sm:$0xff]  ;;  %v261_v9 = vld [vmem:[%s2356_s28 + $0x78] sm:$0xff]  ;;  %p2159_p10 = pnand %p2158_p8, %p2152_p4 }
  0x49   : > { %v440_v7 = vadd.f32 %v291_v5, %v290_v4  ;;  %v350_v10 = vld [vmem:[%s2356_s28 + $0x340] sm:$0xff]  ;;  %v351_v11 = vld [vmem:[%s2356_s28 + $0x348] sm:$0xff]  ;;  %v395_v12 = vadd.f32 %v261_v9, %v260_v8  ;;  %v292_v16 = vld [vmem:[%s2356_s28 + $0x170] sm:$0xff] }
  0x4a   : > { %v530_v13 = vadd.f32 %v351_v11, %v350_v10  ;;  %v322_v14 = vld [vmem:[%s2356_s28 + $0x260] sm:$0xff]  ;;  %v323_v15 = vld [vmem:[%s2356_s28 + $0x268] sm:$0xff]  ;;  %v293_v17 = vld [vmem:[%s2356_s28 + $0x178] sm:$0xff] }
  0x4b   : > { %432 = vadd.xlane.f32.xlu1 %v431_v28  ;;  %v488_v18 = vadd.f32 %v323_v15, %v322_v14  ;;  %v443_v19 = vadd.f32 %v293_v17, %v292_v16  ;;  %v262_v20 = vld [vmem:[%s2356_s28 + $0x80] sm:$0xff]  ;;  %v263_v21 = vld [vmem:[%s2356_s28 + $0x88] sm:$0xff]  ;;  %v352_v22 = vld [vmem:[%s2356_s28 + $0x350] sm:$0xff] }
  0x4c   : > { %384 = vadd.xlane.f32.xlu0 %v383_v29  ;;  %v353_v23 = vld [vmem:[%s2356_s28 + $0x358] sm:$0xff]  ;;  %v398_v24 = vadd.f32 %v263_v21, %v262_v20  ;;  %v324_v26 = vld [vmem:[%s2356_s28 + $0x270] sm:$0xff]  ;;  %v294_v28 = vld [vmem:[%s2356_s28 + $0x180] sm:$0xff] }
  0x4d   : > { %v533_v25 = vadd.f32 %v353_v23, %v352_v22  ;;  %v325_v27 = vld [vmem:[%s2356_s28 + $0x278] sm:$0xff]  ;;  %v295_v29 = vld [vmem:[%s2356_s28 + $0x188] sm:$0xff]  ;;  %v264_v32 = vld [vmem:[%s2356_s28 + $0x90] sm:$0xff] }
  0x4e   : > { %v491_v30 = vadd.f32 %v325_v27, %v324_v26  ;;  %v446_v31 = vadd.f32 %v295_v29, %v294_v28  ;;  %v265_v33 = vld [vmem:[%s2356_s28 + $0x98] sm:$0xff]  ;;  %v326_v38 = vld [vmem:[%s2356_s28 + $0x280] sm:$0xff]  ;;  %v327_v39 = vld [vmem:[%s2356_s28 + $0x288] sm:$0xff] }
  0x4f   : > { %519 = vadd.xlane.f32.xlu1 %v518_v34  ;;  %v354_v34 = vld [vmem:[%s2356_s28 + $0x360] sm:$0xff]  ;;  %v401_v36 = vadd.f32 %v265_v33, %v264_v32  ;;  %v494_v42 = vadd.f32 %v327_v39, %v326_v38  ;;  %v267_v45 = vld [vmem:[%s2356_s28 + $0xa8] sm:$0xff]  ;;  %v328_v50 = vld [vmem:[%s2356_s28 + $0x290] sm:$0xff] }
  0x50   : > { %477 = vadd.xlane.f32.xlu0 %v476_v35  ;;  %v355_v35 = vld [vmem:[%s2356_s28 + $0x368] sm:$0xff]  ;;  %v266_v44 = vld [vmem:[%s2356_s28 + $0xa0] sm:$0xff]  ;;  %v329_v51 = vld [vmem:[%s2356_s28 + $0x298] sm:$0xff] }
  0x51   : > { %v536_v37 = vadd.f32 %v355_v35, %v354_v34  ;;  %v404_v48 = vadd.f32 %v267_v45, %v266_v44  ;;  %v497_v54 = vadd.f32 %v329_v51, %v328_v50  ;;  %v268_v56 = vld [vmem:[%s2356_s28 + $0xb0] sm:$0xff]  ;;  %v269_v57 = vld [vmem:[%s2356_s28 + $0xb8] sm:$0xff]  ;;  %v330_v62 = vld [vmem:[%s2356_s28 + $0x2a0] sm:$0xff]  ;;  %v2218_v50 = vmov 0.0  }
  0x52   : > { %v407_v60 = vadd.f32 %v269_v57, %v268_v56  ;;  %v331_v63 = vld [vmem:[%s2356_s28 + $0x2a8] sm:$0xff]  ;;  %v270_v4 = vld [vmem:[%s2356_s28 + $0xc0] sm:$0xff]  ;;  %v332_v10 = vld [vmem:[%s2356_s28 + $0x2b0] sm:$0xff]  ;;  %1893 = vmatprep.subr.mxu0 %v2218_v50  ;;  %1928 = vmatprep.subr.mxu1 %v2218_v50 }
  0x53   : > { %387 = vadd.xlane.f32.xlu1 %v386_v40  ;;  %v296_v40 = vld [vmem:[%s2356_s28 + $0x190] sm:$0xff]  ;;  %v500_v2 = vadd.f32 %v331_v63, %v330_v62  ;;  %v271_v5 = vld [vmem:[%s2356_s28 + $0xc8] sm:$0xff]  ;;  %v333_v11 = vld [vmem:[%s2356_s28 + $0x2b8] sm:$0xff]  ;;  %1925 = vmatprep.mubr.msk.f32.mxu0 %vm2219_vm0, %v2218_v50 }
  0x54   : > { %522 = vadd.xlane.f32.xlu0 %v521_v41  ;;  %v297_v41 = vld [vmem:[%s2356_s28 + $0x198] sm:$0xff]  ;;  %v410_v8 = vadd.f32 %v271_v5, %v270_v4  ;;  %v503_v14 = vadd.f32 %v333_v11, %v332_v10  ;;  %v272_v16 = vld [vmem:[%s2356_s28 + $0xd0] sm:$0xff]  ;;  %v334_v22 = vld [vmem:[%s2356_s28 + $0x2c0] sm:$0xff]  ;;  %1930 = vmatprep.mubr.msk.f32.mxu1 %vm2219_vm0, %v2218_v50  ;;  %vm1065_vm0 = vcmask 1041409  }
  0x55   : > { %v449_v43 = vadd.f32 %v297_v41, %v296_v40  ;;  %v273_v17 = vld [vmem:[%s2356_s28 + $0xd8] sm:$0xff]  ;;  %v335_v23 = vld [vmem:[%s2356_s28 + $0x2c8] sm:$0xff]  ;;  %v274_v28 = vld [vmem:[%s2356_s28 + $0xe0] sm:$0xff] }
  0x56   : > { %v413_v20 = vadd.f32 %v273_v17, %v272_v16  ;;  %v506_v26 = vadd.f32 %v335_v23, %v334_v22  ;;  %v275_v29 = vld [vmem:[%s2356_s28 + $0xe8] sm:$0xff]  ;;  %v336_v34 = vld [vmem:[%s2356_s28 + $0x2d0] sm:$0xff]  ;;  %v337_v35 = vld [vmem:[%s2356_s28 + $0x2d8] sm:$0xff] }
  0x57   : > { %480 = vadd.xlane.f32.xlu1 %v479_v46  ;;  %v356_v46 = vld [vmem:[%s2356_s28 + $0x370] sm:$0xff]  ;;  %v416_v32 = vadd.f32 %v275_v29, %v274_v28  ;;  %v509_v38 = vadd.f32 %v337_v35, %v336_v34  ;;  %v277_v41 = vld [vmem:[%s2356_s28 + $0xf8] sm:$0xff]  ;;  %v635_v11 = vld [vmem:[%s3237_s1 + $0x28] sm:$0xff] }
  0x58   : > { %435 = vadd.xlane.f32.xlu0 %v434_v47  ;;  %v357_v47 = vld [vmem:[%s2356_s28 + $0x378] sm:$0xff]  ;;  %v276_v40 = vld [vmem:[%s2356_s28 + $0xf0] sm:$0xff]  ;;  %v631_v16 = vld [vmem:[%s3237_s1 + $0x8] sm:$0xff] }
  0x59   : > { %v539_v49 = vadd.f32 %v357_v47, %v356_v46  ;;  %v419_v44 = vadd.f32 %v277_v41, %v276_v40  ;;  %v338_v46 = vld [vmem:[%s2356_s28 + $0x2e0] sm:$0xff]  ;;  %v339_v47 = vld [vmem:[%s2356_s28 + $0x2e8] sm:$0xff]  ;;  %v645_v51 = vld [vmem:[%s3237_s1 + $0x78] sm:$0xff] }
  0x5a   : > { %1894 = vmatpush3.msra.mxu0 %v645_v51  ;;  %v341_v56 = vld [vmem:[%s2356_s28 + $0x2f8] sm:$0xff]  ;;  %v368_v57 = vld [vmem:[%s2356_s28 + $0x3d0] sm:$0xff]  ;;  %v717_v51 = vlaneseq }
  0x5b   : > { %390 = vadd.xlane.f32.xlu1 %v389_v52  ;;  %v298_v52 = vld [vmem:[%s2356_s28 + $0x1a0] sm:$0xff]  ;;  %1895 = vmatprep.subr.mxu0 %v2218_v50  ;;  %v372_v63 = vld [vmem:[%s2356_s28 + $0x3f0] sm:$0xff] }
  0x5c   : > { %525 = vadd.xlane.f32.xlu0 %v524_v53  ;;  %v299_v53 = vld [vmem:[%s2356_s28 + $0x1a8] sm:$0xff]  ;;  %v640_v5 = vld [vmem:[%s3237_s1 + $0x50] sm:$0xff] }
  0x5d   : > { %v452_v55 = vadd.f32 %v299_v53, %v298_v52  ;;  %v512_v52 = vadd.f32 %v339_v47, %v338_v46  ;;  %v644_v53 = vld [vmem:[%s3237_s1 + $0x70] sm:$0xff] }
  0x5e   : > { %1896 = vmatpush3.msra.mxu0 %v644_v53  ;;  %v636_v10 = vld [vmem:[%s3237_s1 + $0x30] sm:$0xff] }
  0x5f   : > { %483 = vadd.xlane.f32.xlu1 %v482_v58  ;;  %v358_v58 = vld [vmem:[%s2356_s28 + $0x380] sm:$0xff]  ;;  %1897 = vmatprep.subr.mxu0 %v2218_v50 }
  0x60   : > { %438 = vadd.xlane.f32.xlu0 %v437_v59  ;;  %v359_v59 = vld [vmem:[%s2356_s28 + $0x388] sm:$0xff] }
  0x61   : > { %v542_v61 = vadd.f32 %v359_v59, %v358_v58  ;;  %v369_v58 = vld [vmem:[%s2356_s28 + $0x3d8] sm:$0xff]  ;;  %v643_v59 = vld [vmem:[%s3237_s1 + $0x68] sm:$0xff] }
  0x62   : > { %1898 = vmatpush3.msra.mxu0 %v643_v59  ;;  %v557_v62 = vadd.f32 %v369_v58, %v368_v57 }
  0x63   : > { %393 = vadd.xlane.f32.xlu1 %v392_v0  ;;  %v300_v0 = vld [vmem:[%s2356_s28 + $0x1b0] sm:$0xff]  ;;  %1899 = vmatprep.subr.mxu0 %v2218_v50 }
  0x64   : > { %528 = vadd.xlane.f32.xlu0 %v527_v1  ;;  %v301_v1 = vld [vmem:[%s2356_s28 + $0x1b8] sm:$0xff] }
  0x65   : > { %v455_v3 = vadd.f32 %v301_v1, %v300_v0  ;;  %v373_v0 = vld [vmem:[%s2356_s28 + $0x3f8] sm:$0xff]  ;;  %v370_v1 = vld [vmem:[%s2356_s28 + $0x3e0] sm:$0xff] }
  0x66   : > { %v563_v4 = vadd.f32 %v373_v0, %v372_v63 }
  0x67   : > { %486 = vadd.xlane.f32.xlu1 %v485_v6  ;;  %v360_v6 = vld [vmem:[%s2356_s28 + $0x390] sm:$0xff] }
  0x68   : > { %441 = vadd.xlane.f32.xlu0 %v440_v7  ;;  %v361_v7 = vld [vmem:[%s2356_s28 + $0x398] sm:$0xff] }
  0x69   : > { %v545_v9 = vadd.f32 %v361_v7, %v360_v6  ;;  %v639_v7 = vld [vmem:[%s3237_s1 + $0x48] sm:$0xff] }
  0x6b   : > { %396 = vadd.xlane.f32.xlu1 %v395_v12  ;;  %v302_v12 = vld [vmem:[%s2356_s28 + $0x1c0] sm:$0xff] }
  0x6c   : > { %531 = vadd.xlane.f32.xlu0 %v530_v13  ;;  %v303_v13 = vld [vmem:[%s2356_s28 + $0x1c8] sm:$0xff] }
  0x6d   : > { %v458_v15 = vadd.f32 %v303_v13, %v302_v12  ;;  %v634_v12 = vld [vmem:[%s3237_s1 + $0x20] sm:$0xff]  ;;  %v633_v13 = vld [vmem:[%s3237_s1 + $0x18] sm:$0xff] }
  0x6f   : > { %489 = vadd.xlane.f32.xlu1 %v488_v18  ;;  %v362_v18 = vld [vmem:[%s2356_s28 + $0x3a0] sm:$0xff] }
  0x70   : > { %444 = vadd.xlane.f32.xlu0 %v443_v19  ;;  %v363_v19 = vld [vmem:[%s2356_s28 + $0x3a8] sm:$0xff] }
  0x71   : > { %v548_v21 = vadd.f32 %v363_v19, %v362_v18  ;;  %v630_v18 = vld [vmem:[%s3237_s1] sm:$0xff] }
  0x73   : > { %399 = vadd.xlane.f32.xlu1 %v398_v24  ;;  %v304_v24 = vld [vmem:[%s2356_s28 + $0x1d0] sm:$0xff] }
  0x74   : > { %534 = vadd.xlane.f32.xlu0 %v533_v25  ;;  %v305_v25 = vld [vmem:[%s2356_s28 + $0x1d8] sm:$0xff] }
  0x75   : > { %v461_v27 = vadd.f32 %v305_v25, %v304_v24 }
  0x77   : > { %492 = vadd.xlane.f32.xlu1 %v491_v30  ;;  %v364_v30 = vld [vmem:[%s2356_s28 + $0x3b0] sm:$0xff] }
  0x78   : > { %447 = vadd.xlane.f32.xlu0 %v446_v31  ;;  %v365_v31 = vld [vmem:[%s2356_s28 + $0x3b8] sm:$0xff] }
  0x79   : > { %v551_v33 = vadd.f32 %v365_v31, %v364_v30 }
  0x7b   : > { %402 = vadd.xlane.f32.xlu1 %v401_v36  ;;  %v306_v36 = vld [vmem:[%s2356_s28 + $0x1e0] sm:$0xff] }
  0x7c   : > { %537 = vadd.xlane.f32.xlu0 %v536_v37  ;;  %v307_v37 = vld [vmem:[%s2356_s28 + $0x1e8] sm:$0xff] }
  0x7d   : > { %v464_v39 = vadd.f32 %v307_v37, %v306_v36 }
  0x7f   : > { %495 = vadd.xlane.f32.xlu1 %v494_v42  ;;  %v366_v42 = vld [vmem:[%s2356_s28 + $0x3c0] sm:$0xff] }
  0x80   : > { %450 = vadd.xlane.f32.xlu0 %v449_v43  ;;  %v367_v43 = vld [vmem:[%s2356_s28 + $0x3c8] sm:$0xff] }
  0x81   : > { %v554_v45 = vadd.f32 %v367_v43, %v366_v42 }
  0x83   : > { %405 = vadd.xlane.f32.xlu1 %v404_v48  ;;  %v308_v48 = vld [vmem:[%s2356_s28 + $0x1f0] sm:$0xff] }
  0x84   : > { %540 = vadd.xlane.f32.xlu0 %v539_v49  ;;  %v309_v49 = vld [vmem:[%s2356_s28 + $0x1f8] sm:$0xff] }
  0x87   : > { %498 = vadd.xlane.f32.xlu1 %v497_v54  ;;  %v467_v54 = vadd.f32 %v309_v49, %v308_v48 }
  0x88   : > { %453 = vadd.xlane.f32.xlu0 %v452_v55  ;;  %v340_v55 = vld [vmem:[%s2356_s28 + $0x2f0] sm:$0xff] }
  0x8b   : > { %408 = vadd.xlane.f32.xlu1 %v407_v60  ;;  %v515_v60 = vadd.f32 %v341_v56, %v340_v55  ;;  %v2631_v56 = vshrl.u32 %v717_v51, 7 }
  0x8c   : > { %543 = vadd.xlane.f32.xlu0 %v542_v61  ;;  %v642_v61 = vld [vmem:[%s3237_s1 + $0x60] sm:$0xff] }
  0x8d   : > { %1900 = vmatpush3.msra.mxu0 %v642_v61 }
  0x8e   : > { %1901 = vmatprep.subr.mxu0 %v2218_v50 }
  0x8f   : > { %501 = vadd.xlane.f32.xlu1 %v500_v2  ;;  %v371_v2 = vld [vmem:[%s2356_s28 + $0x3e8] sm:$0xff] }
  0x90   : > { %456 = vadd.xlane.f32.xlu0 %v455_v3  ;;  %v641_v3 = vld [vmem:[%s3237_s1 + $0x58] sm:$0xff]  ;;  %v560_v6 = vadd.f32 %v371_v2, %v370_v1 }
  0x91   : > { %1902 = vmatpush3.msra.mxu0 %v641_v3 }
  0x92   : > { %1903 = vmatprep.subr.mxu0 %v2218_v50 }
  0x93   : > { %411 = vadd.xlane.f32.xlu1 %v410_v8  ;;  %1904 = vmatpush3.msra.mxu0 %v640_v5  ;;  %v638_v8 = vld [vmem:[%s3237_s1 + $0x40] sm:$0xff] }
  0x94   : > { %546 = vadd.xlane.f32.xlu0 %v545_v9  ;;  %1905 = vmatprep.subr.mxu0 %v2218_v50  ;;  %v637_v9 = vld [vmem:[%s3237_s1 + $0x38] sm:$0xff] }
  0x95   : > { %1906 = vmatpush3.msra.mxu0 %v639_v7 }
  0x96   : > { %1907 = vmatprep.subr.mxu0 %v2218_v50 }
  0x97   : > { %504 = vadd.xlane.f32.xlu1 %v503_v14  ;;  %1908 = vmatpush3.msra.mxu0 %v638_v8  ;;  %v632_v14 = vld [vmem:[%s3237_s1 + $0x10] sm:$0xff] }
  0x98   : > { %459 = vadd.xlane.f32.xlu0 %v458_v15  ;;  %1909 = vmatprep.subr.mxu0 %v2218_v50 }
  0x99   : > { %1910 = vmatpush3.msra.mxu0 %v637_v9 }
  0x9a   : > { %1911 = vmatprep.subr.mxu0 %v2218_v50 }
  0x9b   : > { %414 = vadd.xlane.f32.xlu1 %v413_v20  ;;  %1912 = vmatpush3.msra.mxu0 %v636_v10 }
  0x9c   : > { %549 = vadd.xlane.f32.xlu0 %v548_v21  ;;  %1913 = vmatprep.subr.mxu0 %v2218_v50 }
  0x9d   : > { %1914 = vmatpush3.msra.mxu0 %v635_v11 }
  0x9e   : > { %1915 = vmatprep.subr.mxu0 %v2218_v50 }
  0x9f   : > { %507 = vadd.xlane.f32.xlu1 %v506_v26  ;;  %1916 = vmatpush3.msra.mxu0 %v634_v12 }
  0xa0   : > { %462 = vadd.xlane.f32.xlu0 %v461_v27  ;;  %1917 = vmatprep.subr.mxu0 %v2218_v50 }
  0xa1   : > { %1918 = vmatpush3.msra.mxu0 %v633_v13 }
  0xa2   : > { %1919 = vmatprep.subr.mxu0 %v2218_v50 }
  0xa3   : > { %417 = vadd.xlane.f32.xlu1 %v416_v32  ;;  %1920 = vmatpush3.msra.mxu0 %v632_v14 }
  0xa4   : > { %552 = vadd.xlane.f32.xlu0 %v551_v33  ;;  %1921 = vmatprep.subr.mxu0 %v2218_v50 }
  0xa5   : > { %1922 = vmatpush3.msra.mxu0 %v631_v16 }
  0xa6   : > { %1923 = vmatprep.subr.mxu0 %v2218_v50 }
  0xa7   : > { %510 = vadd.xlane.f32.xlu1 %v509_v38  ;;  %1924 = vmatpush3.msra.mxu0 %v630_v18 }
  0xa8   : > { %465 = vadd.xlane.f32.xlu0 %v464_v39 }
  0xab   : > { %420 = vadd.xlane.f32.xlu1 %v419_v44 }
  0xac   : > { %555 = vadd.xlane.f32.xlu0 %v554_v45 }
  0xaf   : > { %513 = vadd.xlane.f32.xlu1 %v512_v52 }
  0xb0   : > { %468 = vadd.xlane.f32.xlu0 %v467_v54  ;;  %v718_v54 = vand.u32 127, %v717_v51 }
  0xb2   : > { %v723_v58 = vadd.s32 4294967288, %v718_v54  ;;  %v730_v59 = vadd.s32 4294967280, %v718_v54  ;;  %v744_v61 = vadd.s32 4294967264, %v718_v54  ;;  %v758_v63 = vadd.s32 4294967248, %v718_v54 }
  0xb3   : > { %516 = vadd.xlane.f32.xlu1 %v515_v60  ;;  %v737_v60 = vadd.s32 4294967272, %v718_v54  ;;  %v765_v0 = vadd.s32 4294967240, %v718_v54  ;;  %v772_v1 = vadd.s32 4294967232, %v718_v54  ;;  %v2638_v3 = vsub.s32 %v718_v54, %v2631_v56 }
  0xb4   : > { %558 = vadd.xlane.f32.xlu0 %v557_v62  ;;  %v751_v62 = vadd.s32 4294967256, %v718_v54  ;;  %v786_v5 = vadd.s32 4294967216, %v718_v54  ;;  %v793_v7 = vadd.s32 4294967208, %v718_v54  ;;  %v2643_v8 = vsub.s32 %v723_v58, %v2631_v56 }
  0xb5   : > { %v2646_v9 = vsub.s32 %v730_v59, %v2631_v56  ;;  %v800_v10 = vadd.s32 4294967200, %v718_v54  ;;  %v2649_v11 = vsub.s32 %v737_v60, %v2631_v56  ;;  %v2652_v12 = vsub.s32 %v744_v61, %v2631_v56 }
  0xb6   : > { %v2655_v13 = vsub.s32 %v751_v62, %v2631_v56  ;;  %v2658_v14 = vsub.s32 %v758_v63, %v2631_v56  ;;  %v2661_v16 = vsub.s32 %v765_v0, %v2631_v56  ;;  %v2664_v18 = vsub.s32 %v772_v1, %v2631_v56 }
  0xb7   : > { %564 = vadd.xlane.f32.xlu1 %v563_v4  ;;  %v779_v4 = vadd.s32 4294967224, %v718_v54  ;;  %v807_v58 = vadd.s32 4294967192, %v718_v54  ;;  %v814_v59 = vadd.s32 4294967184, %v718_v54  ;;  %v2673_v62 = vsub.s32 %v786_v5, %v2631_v56 }
  0xb8   : > { %561 = vadd.xlane.f32.xlu0 %v560_v6  ;;  %v2676_v63 = vsub.s32 %v793_v7, %v2631_v56 }
  0xb9   : > { %v2670_v61 = vsub.s32 %v779_v4, %v2631_v56  ;;  %3257 = vst [vmem:[#allocation10_spill] sm:$0xff] %v2673_v62 }
  0xba   : > { %3258 = vst [vmem:[#allocation11_spill] sm:$0xff] %v2676_v63 }
  0xc4   : > { %v2547_v15 = vpop.xlane.xlu1 %423 }
  0xc5   : > { %v2552_v17 = vpop.xlane.xlu0 %375  ;;  %v582_v1 = vmul.f32 0.00390625, %v2547_v15 }
  0xc6   : > { %v566_v63 = vmul.f32 0.00390625, %v2552_v17 }
  0xc7   : > { %v831_v17 = vrot.slane %v582_v1, %v2638_v3 }
  0xc8   : > { %v2561_v19 = vpop.xlane.xlu1 %426 }
  0xc9   : > { %v2563_v20 = vpop.xlane.xlu0 %378  ;;  %v583_v60 = vmul.f32 0.00390625, %v2561_v19  ;;  %v2684_v19 = vsub.s32 %v800_v10, %v2631_v56 }
  0xcb   : > { %3260 = vst [vmem:[#allocation13_spill] sm:$0xff] %v2684_v19 }
  0xcc   : > { %v2565_v21 = vpop.xlane.xlu1 %429 }
  0xcd   : > { %v2567_v22 = vpop.xlane.xlu0 %381 }
  0xce   : > { %v568_v4 = vmul.f32 0.00390625, %v2567_v22  ;;  %v835_v22 = vrot.slane %v583_v60, %v2643_v8 }
  0xd0   : > { %v2569_v23 = vpop.xlane.xlu1 %474 }
  0xd1   : > { %v2571_v24 = vpop.xlane.xlu0 %471  ;;  %v599_v5 = vmul.f32 0.00390625, %v2569_v23 }
  0xd2   : > { %v598_v62 = vmul.f32 0.00390625, %v2571_v24 }
  0xd4   : > { %v2573_v25 = vpop.xlane.xlu1 %432  ;;  %v910_v60 = vrot.slane %v598_v62, %v2638_v3 }
  0xd5   : > { %v2575_v26 = vpop.xlane.xlu0 %384  ;;  %v585_v7 = vmul.f32 0.00390625, %v2573_v25  ;;  %v821_v25 = vadd.s32 4294967176, %v718_v54 }
  0xd6   : > { %v569_v15 = vmul.f32 0.00390625, %v2575_v26 }
  0xd8   : > { %v2577_v27 = vpop.xlane.xlu1 %519  ;;  %v741_v54 = vrot.slane %v569_v15, %v2649_v11 }
  0xd9   : > { %v2579_v28 = vpop.xlane.xlu0 %477  ;;  %v614_v1 = vmul.f32 0.00390625, %v2577_v27 }
  0xda   : > { %v600_v23 = vmul.f32 0.00390625, %v2579_v28  ;;  %v845_v28 = vrot.slane %v585_v7, %v2649_v11 }
  0xdc   : > { %v2581_v29 = vpop.xlane.xlu1 %387 }
  0xdd   : > { %v2583_v30 = vpop.xlane.xlu0 %522  ;;  %v570_v24 = vmul.f32 0.00390625, %v2581_v29  ;;  %v722_v29 = vrot.slane %v566_v63, %v2638_v3 }
  0xe0   : > { %v2585_v31 = vpop.xlane.xlu1 %480 }
  0xe1   : > { %v2587_v32 = vpop.xlane.xlu0 %435 }
  0xe2   : > { %v586_v62 = vmul.f32 0.00390625, %v2587_v32 }
  0xe4   : > { %v2589_v33 = vpop.xlane.xlu1 %390 }
  0xe5   : > { %v2591_v34 = vpop.xlane.xlu0 %525 }
  0xe8   : > { %v2593_v35 = vpop.xlane.xlu1 %483 }
  0xe9   : > { %v2595_v36 = vpop.xlane.xlu0 %438 }
  0xec   : > { %v2597_v37 = vpop.xlane.xlu1 %393 }
  0xed   : > { %v2599_v38 = vpop.xlane.xlu0 %528 }
  0xf0   : > { %v2601_v39 = vpop.xlane.xlu1 %486 }
  0xf1   : > { %v2603_v40 = vpop.xlane.xlu0 %441 }
  0xf4   : > { %v2605_v41 = vpop.xlane.xlu1 %396 }
  0xf5   : > { %v2607_v42 = vpop.xlane.xlu0 %531 }
  0xf8   : > { %v2609_v43 = vpop.xlane.xlu1 %489 }
  0xf9   : > { %v2611_v44 = vpop.xlane.xlu0 %444 }
  0xfc   : > { %v2613_v45 = vpop.xlane.xlu1 %399 }
  0xfd   : > { %v2615_v46 = vpop.xlane.xlu0 %534 }
 0x100   : > { %v2617_v47 = vpop.xlane.xlu1 %492 }
 0x101   : > { %v2619_v48 = vpop.xlane.xlu0 %447 }
 0x104   : > { %v2621_v49 = vpop.xlane.xlu1 %402 }
 0x105   : > { %v2623_v50 = vpop.xlane.xlu0 %537 }
 0x108   : > { %v2625_v52 = vpop.xlane.xlu1 %495 }
 0x109   : > { %v2627_v53 = vpop.xlane.xlu0 %450 }
 0x10c   : > { %v2629_v55 = vpop.xlane.xlu1 %405 }
 0x10d   : > { %v2633_v57 = vpop.xlane.xlu0 %540 }
 0x110   : > { %v2635_v2 = vpop.xlane.xlu1 %498 }
 0x111   : > { %v2640_v6 = vpop.xlane.xlu0 %453 }
 0x112   : > { %3255 = vst [vmem:[#allocation8_spill] sm:$0xff] %v2640_v6  ;;  %v567_v6 = vmul.f32 0.00390625, %v2563_v20  ;;  %v2695_v20 = vsub.s32 %v807_v58, %v2631_v56  ;;  %v615_v58 = vmul.f32 0.00390625, %v2583_v30  ;;  %v836_v30 = vsel %vm728_vm1, %v835_v22, %v831_v17 }
 0x113   : > { %v989_v17 = vrot.slane %v614_v1, %v2638_v3  ;;  %v587_v3 = vmul.f32 0.00390625, %v2595_v36  ;;  %v573_v1 = vmul.f32 0.00390625, %v2605_v41  ;;  %v604_v36 = vmul.f32 0.00390625, %v2609_v43 }
 0x114   : > { %v2666_v51 = vpop.xlane.xlu1 %408  ;;  %3261 = vst [vmem:[#allocation14_spill] sm:$0xff] %v2695_v20  ;;  %v727_v26 = vrot.slane %v567_v6, %v2643_v8  ;;  %v601_v6 = vmul.f32 0.00390625, %v2585_v31  ;;  %v993_v27 = vrot.slane %v615_v58, %v2643_v8  ;;  %v2729_v31 = vsub.s32 %v821_v25, %v2631_v56 }
 0x115   : > { %3256 = vst [vmem:[#allocation9_spill] sm:$0xff] %v2666_v51  ;;  %v2678_v0 = vpop.xlane.xlu0 %543  ;;  %v584_v51 = vmul.f32 0.00390625, %v2565_v21  ;;  %v2698_v21 = vsub.s32 %v814_v59, %v2631_v56  ;;  %v734_v59 = vrot.slane %v568_v4, %v2646_v9  ;;  %v919_v4 = vrot.slane %v600_v23, %v2646_v9 }
 0x116   : > { %3259 = vst [vmem:[#allocation12_spill] sm:$0xff] %v2678_v0  ;;  %v729_v63 = vsel %vm728_vm1, %v727_v26, %v722_v29  ;;  %v850_v58 = vrot.slane %v586_v62, %v2652_v12  ;;  %v603_v29 = vmul.f32 0.00390625, %v2601_v39  ;;  %v589_v39 = vmul.f32 0.00390625, %v2611_v44 }
 0x117   : > { %3262 = vst [vmem:[#allocation15_spill] sm:$0xff] %v2698_v21  ;;  %v840_v19 = vrot.slane %v584_v51, %v2646_v9  ;;  %v914_v21 = vrot.slane %v599_v5, %v2643_v8  ;;  %v748_v5 = vrot.slane %v570_v24, %v2652_v12  ;;  %v736_v20 = vsel %vm735_vm2, %v734_v59, %v729_v63 }
 0x118   : > { %v2692_v0 = vpop.xlane.xlu1 %501  ;;  %v571_v24 = vmul.f32 0.00390625, %v2589_v33  ;;  %v743_v32 = vsel %vm742_vm3, %v741_v54, %v736_v20  ;;  %v616_v8 = vmul.f32 0.00390625, %v2591_v34  ;;  %v602_v33 = vmul.f32 0.00390625, %v2593_v35 }
 0x119   : > { %v2703_v10 = vpop.xlane.xlu0 %456  ;;  %v841_v15 = vsel %vm735_vm2, %v840_v19, %v836_v30  ;;  %v915_v22 = vsel %vm728_vm1, %v914_v21, %v910_v60  ;;  %v924_v19 = vrot.slane %v601_v6, %v2649_v11  ;;  %v750_v21 = vsel %vm749_vm4, %v748_v5, %v743_v32 }
 0x11a   : > { %v846_v23 = vsel %vm742_vm3, %v845_v28, %v841_v15  ;;  %v920_v26 = vsel %vm735_vm2, %v919_v4, %v915_v22  ;;  %v994_v20 = vsel %vm728_vm1, %v993_v27, %v989_v17  ;;  %v572_v60 = vmul.f32 0.00390625, %v2597_v37 }
 0x11b   : > { %v617_v34 = vmul.f32 0.00390625, %v2599_v38  ;;  %v755_v28 = vrot.slane %v571_v24, %v2655_v13  ;;  %v588_v54 = vmul.f32 0.00390625, %v2603_v40  ;;  %v925_v35 = vsel %vm742_vm3, %v924_v19, %v920_v26 }
 0x11c   : > { %v2717_v51 = vpop.xlane.xlu1 %411  ;;  %v998_v6 = vrot.slane %v616_v8, %v2646_v9  ;;  %v618_v30 = vmul.f32 0.00390625, %v2607_v42  ;;  %v851_v38 = vsel %vm749_vm4, %v850_v58, %v846_v23  ;;  %v929_v4 = vrot.slane %v602_v33, %v2652_v12 }
 0x11d   : > { %v2723_v7 = vpop.xlane.xlu0 %546  ;;  %v574_v40 = vmul.f32 0.00390625, %v2613_v45  ;;  %v855_v41 = vrot.slane %v587_v3, %v2655_v13  ;;  %v762_v9 = vrot.slane %v572_v60, %v2658_v14  ;;  %v1003_v42 = vrot.slane %v617_v34, %v2649_v11 }
 0x11e   : > { %v619_v43 = vmul.f32 0.00390625, %v2615_v46  ;;  %v757_v62 = vsel %vm756_vm5, %v755_v28, %v750_v21  ;;  %v934_v63 = vrot.slane %v603_v29, %v2655_v13  ;;  %v860_v15 = vrot.slane %v588_v54, %v2658_v14 }
 0x11f   : > { %v769_v44 = vrot.slane %v573_v1, %v2661_v16  ;;  %v999_v45 = vsel %vm735_vm2, %v998_v6, %v994_v20  ;;  %v1008_v27 = vrot.slane %v618_v30, %v2652_v12  ;;  %v939_v22 = vrot.slane %v604_v36, %v2658_v14 }
 0x120   : > { %v2739_v25 = vpop.xlane.xlu1 %504  ;;  %v605_v23 = vmul.f32 0.00390625, %v2617_v47  ;;  %v930_v46 = vsel %vm749_vm4, %v929_v4, %v925_v35  ;;  %v865_v24 = vrot.slane %v589_v39, %v2661_v16  ;;  %v776_v32 = vrot.slane %v574_v40, %v2664_v18  ;;  %v3263_v4 = vld [vmem:[#allocation8_spill] sm:$0xff]  ;;  %v3264_v40 = vld [vmem:[#allocation9_spill] sm:$0xff] }
 0x121   : > { %v2745_v59 = vpop.xlane.xlu0 %459  ;;  %v590_v17 = vmul.f32 0.00390625, %v2619_v48  ;;  %v856_v8 = vsel %vm756_vm5, %v855_v41, %v851_v38  ;;  %v764_v12 = vsel %vm763_vm6, %v762_v9, %v757_v62  ;;  %v1004_v26 = vsel %vm742_vm3, %v1003_v42, %v999_v45  ;;  %v3265_v42 = vld [vmem:[#allocation12_spill] sm:$0xff]  ;;  %v3266_v45 = vld [vmem:[#allocation10_spill] sm:$0xff] }
 0x122   : > { %v1013_v47 = vrot.slane %v619_v43, %v2655_v13  ;;  %v935_v21 = vsel %vm756_vm5, %v934_v63, %v930_v46  ;;  %v861_v58 = vsel %vm763_vm6, %v860_v15, %v856_v8  ;;  %v771_v33 = vsel %vm770_vm7, %v769_v44, %v764_v12 }
 0x123   : > { %v575_v20 = vmul.f32 0.00390625, %v2621_v49  ;;  %v1009_v48 = vsel %vm749_vm4, %v1008_v27, %v1004_v26  ;;  %v940_v3 = vsel %vm763_vm6, %v939_v22, %v935_v21  ;;  %v944_v60 = vrot.slane %v605_v23, %v2661_v16  ;;  %v3268_v26 = vld [vmem:[#allocation13_spill] sm:$0xff] }
 0x124   : > { %v2759_v37 = vpop.xlane.xlu1 %414  ;;  %v620_v34 = vmul.f32 0.00390625, %v2623_v50  ;;  %v866_v13 = vsel %vm770_vm7, %v865_v24, %v861_v58  ;;  %v778_v29 = vsel %vm777_vm8, %v776_v32, %v771_v33  ;;  %v870_v54 = vrot.slane %v590_v17, %v2664_v18  ;;  %v3267_v24 = vld [vmem:[#allocation11_spill] sm:$0xff] }
 0x125   : > { %v2765_v5 = vpop.xlane.xlu0 %549  ;;  %v606_v49 = vmul.f32 0.00390625, %v2625_v52  ;;  %v1014_v35 = vsel %vm756_vm5, %v1013_v47, %v1009_v48  ;;  %v591_v6 = vmul.f32 0.00390625, %v2627_v53  ;;  %v576_v30 = vmul.f32 0.00390625, %v2629_v55 }
 0x126   : > { %v621_v50 = vmul.f32 0.00390625, %v2633_v57  ;;  %v783_v36 = vrot.slane %v575_v20, %v2670_v61  ;;  %v607_v38 = vmul.f32 0.00390625, %v2635_v2  ;;  %v592_v39 = vmul.f32 0.00390625, %v3263_v4 }
 0x127   : > { %v577_v41 = vmul.f32 0.00390625, %v3264_v40  ;;  %v945_v52 = vsel %vm770_vm7, %v944_v60, %v940_v3  ;;  %v1018_v9 = vrot.slane %v620_v34, %v2658_v14  ;;  %v622_v43 = vmul.f32 0.00390625, %v3265_v42 }
 0x128   : > { %v2779_v11 = vpop.xlane.xlu1 %507  ;;  %v608_v53 = vmul.f32 0.00390625, %v2692_v0  ;;  %v871_v57 = vsel %vm777_vm8, %v870_v54, %v866_v13  ;;  %v949_v62 = vrot.slane %v606_v49, %v2664_v18  ;;  %v593_v63 = vmul.f32 0.00390625, %v2703_v10 }
 0x129   : > { %v2785_v19 = vpop.xlane.xlu0 %462  ;;  %v578_v2 = vmul.f32 0.00390625, %v2717_v51  ;;  %v875_v44 = vrot.slane %v591_v6, %v2670_v61  ;;  %v790_v27 = vrot.slane %v576_v30, %v3266_v45  ;;  %v1023_v14 = vrot.slane %v621_v50, %v2661_v16 }
 0x12a   : > { %v623_v22 = vmul.f32 0.00390625, %v2723_v7  ;;  %v785_v0 = vsel %vm784_vm9, %v783_v36, %v778_v29  ;;  %v954_v23 = vrot.slane %v607_v38, %v2670_v61  ;;  %v880_v46 = vrot.slane %v592_v39, %v3266_v45  ;;  %v3269_v39 = vld [vmem:[#allocation14_spill] sm:$0xff] }
 0x12b   : > { %v797_v32 = vrot.slane %v577_v41, %v3267_v24  ;;  %v1019_v10 = vsel %vm763_vm6, %v1018_v9, %v1014_v35  ;;  %v1028_v51 = vrot.slane %v622_v43, %v2664_v18  ;;  %v959_v17 = vrot.slane %v608_v53, %v3266_v45 }
 0x12c   : > { %v2799_v28 = vpop.xlane.xlu1 %417  ;;  %v609_v8 = vmul.f32 0.00390625, %v2739_v25  ;;  %v950_v7 = vsel %vm777_vm8, %v949_v62, %v945_v52  ;;  %v885_v12 = vrot.slane %v593_v63, %v3267_v24  ;;  %v804_v47 = vrot.slane %v578_v2, %v3268_v26 }
 0x12d   : > { %v2805_v1 = vpop.xlane.xlu0 %552  ;;  %v594_v21 = vmul.f32 0.00390625, %v2745_v59  ;;  %v876_v33 = vsel %vm784_vm9, %v875_v44, %v871_v57  ;;  %v792_v20 = vsel %vm791_vm10, %v790_v27, %v785_v0  ;;  %v1024_v18 = vsel %vm770_vm7, %v1023_v14, %v1019_v10 }
 0x12e   : > { %v1033_v48 = vrot.slane %v623_v22, %v2670_v61  ;;  %v955_v25 = vsel %vm784_vm9, %v954_v23, %v950_v7  ;;  %v881_v3 = vsel %vm791_vm10, %v880_v46, %v876_v33  ;;  %v799_v60 = vsel %vm798_vm11, %v797_v32, %v792_v20 }
 0x12f   : > { %v579_v34 = vmul.f32 0.00390625, %v2759_v37  ;;  %v1029_v13 = vsel %vm777_vm8, %v1028_v51, %v1024_v18  ;;  %v960_v59 = vsel %vm791_vm10, %v959_v17, %v955_v25  ;;  %v964_v29 = vrot.slane %v609_v8, %v3267_v24 }
 0x130   : > { %v511_v55 = vpop.xlane.xlu1 %510  ;;  %v610_v54 = vmul.f32 0.00390625, %v2779_v11  ;;  %v886_v35 = vsel %vm798_vm11, %v885_v12, %v881_v3  ;;  %v806_v61 = vsel %vm805_vm12, %v804_v47, %v799_v60  ;;  %v890_v6 = vrot.slane %v594_v21, %v3268_v26 }
 0x131   : > { %v466_v15 = vpop.xlane.xlu0 %465  ;;  %v595_v30 = vmul.f32 0.00390625, %v2785_v19  ;;  %v1034_v37 = vsel %vm784_vm9, %v1033_v48, %v1029_v13  ;;  %v624_v36 = vmul.f32 0.00390625, %v2765_v5  ;;  %v611_v38 = vmul.f32 0.00390625, %v511_v55 }
 0x132   : > { %v596_v4 = vmul.f32 0.00390625, %v466_v15  ;;  %v811_v11 = vrot.slane %v579_v34, %v3269_v39  ;;  %v625_v40 = vmul.f32 0.00390625, %v2805_v1  ;;  %v965_v9 = vsel %vm798_vm11, %v964_v29, %v960_v59  ;;  %v3270_v15 = vld [vmem:[#allocation15_spill] sm:$0xff] }
 0x133   : > { %v969_v19 = vrot.slane %v610_v54, %v3268_v26  ;;  %v580_v42 = vmul.f32 0.00390625, %v2799_v28  ;;  %vm1067_vm1 = vcmask 1042434   ;;  %v891_v5 = vsel %vm805_vm12, %v890_v6, %v886_v35  ;;  %v1859_v35 = vld [vmem:[%s3238_s2] ss:$0 sm:$0xff] }
 0x134   : > { %v421_v16 = vpop.xlane.xlu1 %420  ;;  %v895_v55 = vrot.slane %v595_v30, %v3269_v39  ;;  %v1038_v1 = vrot.slane %v624_v36, %v3266_v45  ;;  %v974_v2 = vrot.slane %v611_v38, %v3269_v39  ;;  %v900_v44 = vrot.slane %v596_v4, %v3270_v15 }
 0x135   : > { %v556_v58 = vpop.xlane.xlu0 %555  ;;  %v581_v57 = vmul.f32 0.00390625, %v421_v16  ;;  %v813_v14 = vsel %vm812_vm13, %v811_v11, %v806_v61  ;;  %v1043_v28 = vrot.slane %v625_v40, %v3267_v24  ;;  %v970_v23 = vsel %vm805_vm12, %v969_v19, %v965_v9 }
 0x136   : > { %v626_v43 = vmul.f32 0.00390625, %v556_v58  ;;  %v818_v46 = vrot.slane %v580_v42, %v3270_v15  ;;  %v896_v51 = vsel %vm812_vm13, %v895_v55, %v891_v5  ;;  %v1039_v7 = vsel %vm791_vm10, %v1038_v1, %v1034_v37 }
 0x137   : > { %v825_v17 = vrot.slane %v581_v57, %v2729_v31  ;;  %v975_v12 = vsel %vm812_vm13, %v974_v2, %v970_v23  ;;  %v901_v47 = vsel %vm819_vm14, %v900_v44, %v896_v51  ;;  %vm1069_vm2 = vcmask 1043459   ;;  %v1998_v51 = vld [vmem:[%s2356_s28 + $0x28] sm:$0xff] }
 0x138   : > { %v514_v49 = vpop.xlane.xlu1 %513  ;;  %v1048_v32 = vrot.slane %v626_v43, %v3268_v26  ;;  %v1044_v26 = vsel %vm798_vm11, %v1043_v28, %v1039_v7  ;;  %v820_v18 = vsel %vm819_vm14, %v818_v46, %v813_v14  ;;  %vm1157_vm3 = vcmask 64512   ;;  %v1995_v28 = vld [vmem:[%s2356_s28] sm:$0xff] }
 0x139   : > { %v469_v50 = vpop.xlane.xlu0 %468  ;;  %v612_v41 = vmul.f32 0.00390625, %v514_v49  ;;  %v827_v60 = vsel %vm826_vm15, %v825_v17, %v820_v18  ;;  %v1149_v49 = vld [vmem:[%s3239_s3] sm:$0xff]  ;;  %v1239_v42 = vsub.s32 0, %v2631_v56  ;;  %v1306_v5 = vsub.s32 1, %v2631_v56 }
 0x13a   : > { %v597_v52 = vmul.f32 0.00390625, %v469_v50  ;;  %v1049_v48 = vsel %vm805_vm12, %v1048_v32, %v1044_v26  ;;  %1929 = vmatpush3.msra.mxu1 %v1149_v49  ;;  %v1373_v57 = vsub.s32 2, %v2631_v56  ;;  %v2008_v49 = vld [vmem:[%s2356_s28 + $0x88] sm:$0xff] }
 0x13b   : > { %v979_v22 = vrot.slane %v612_v41, %v3270_v15 }
 0x13c   : > { %v517_v53 = vpop.xlane.xlu1 %516  ;;  %v905_v0 = vrot.slane %v597_v52, %v2729_v31 }
 0x13d   : > { %v613_v62 = vmul.f32 0.00390625, %v517_v53  ;;  %v559_v63 = vpop.xlane.xlu0 %558  ;;  %v980_v58 = vsel %vm819_vm14, %v979_v22, %v975_v12 }
 0x13e   : > { %v627_v27 = vmul.f32 0.00390625, %v559_v63  ;;  %v906_v33 = vsel %vm826_vm15, %v905_v0, %v901_v47  ;;  %v1440_v63 = vsub.s32 3, %v2631_v56  ;;  %v1996_v0 = vld [vmem:[%s2356_s28 + $0x8] sm:$0xff] }
 0x13f   : > { %v984_v45 = vrot.slane %v613_v62, %v2729_v31  ;;  %v1066_v59 = vsel %vm1065_vm0, %v906_v33, %v827_v60 }
 0x140   : > { %v565_v10 = vpop.xlane.xlu1 %564  ;;  %v1053_v8 = vrot.slane %v627_v27, %v3269_v39  ;;  %v1861_v39 = vld [vmem:[%s3240_s4] ss:$0 sm:$0xff]  ;;  %v1994_v27 = vld [vmem:[%s2356_s28 + $0x18] sm:$0xff] }
 0x141   : > { %v562_v24 = vpop.xlane.xlu0 %561  ;;  %v629_v16 = vmul.f32 0.00390625, %v565_v10  ;;  %v985_v3 = vsel %vm826_vm15, %v984_v45, %v980_v58  ;;  %v1997_v45 = vld [vmem:[%s2356_s28 + $0x20] sm:$0xff]  ;;  %v2002_v58 = vld [vmem:[%s2356_s28 + $0x38] sm:$0xff] }
 0x142   : > { %v628_v21 = vmul.f32 0.00390625, %v562_v24  ;;  %v1054_v34 = vsel %vm812_vm13, %v1053_v8, %v1049_v48  ;;  %v1999_v8 = vld [vmem:[%s2356_s28 + $0x40] sm:$0xff]  ;;  %v2004_v48 = vld [vmem:[%s2356_s28 + $0x68] sm:$0xff] }
 0x143   : > { %v1063_v20 = vrot.slane %v629_v16, %v2729_v31  ;;  %v1068_v31 = vsel %vm1067_vm1, %v985_v3, %v1066_v59  ;;  %v2000_v16 = vld [vmem:[%s2356_s28 + $0x48] sm:$0xff]  ;;  %v2006_v59 = vld [vmem:[%s2356_s28 + $0x58] sm:$0xff] }
 0x144   : > { %v1058_v25 = vrot.slane %v628_v21, %v3270_v15  ;;  %v1993_v15 = vld [vmem:[%s2356_s28 + $0x10] sm:$0xff] }
 0x145   : > { %v2001_v21 = vld [vmem:[%s2356_s28 + $0x30] sm:$0xff] }
 0x146   : > { %v1059_v13 = vsel %vm819_vm14, %v1058_v25, %v1054_v34  ;;  %v2005_v34 = vld [vmem:[%s2356_s28 + $0x50] sm:$0xff] }
 0x147   : > { %v1064_v29 = vsel %vm826_vm15, %v1063_v20, %v1059_v13  ;;  %v2003_v20 = vld [vmem:[%s2356_s28 + $0x60] sm:$0xff] }
 0x148   : > { %v1070_v54 = vsel %vm1069_vm2, %v1064_v29, %v1068_v31  ;;  %v2007_v31 = vld [vmem:[%s2356_s28 + $0x80] sm:$0xff] }
 0x149   : > { %1926 = vmatmul.mubr.f32.vlgmr.msra.gmra.mxu0 %v1070_v54 }
 0x209   : > { %v1138_v61 = vpop.f32.mrf.mxu0 }
 0x20a   : > { %v1139_v6 = vadd.f32 %v1859_v35, %v1138_v61 }
 0x20b   : > { %v1927_v30 = vpop.f32.mrf.mxu0 }
 0x20c   : > { %v1860_v50 = vmul.f32 -1.442695, %v1139_v6  ;;  %v2009_v30 = vld [vmem:[%s2356_s28 + $0x70] sm:$0xff] }
 0x20e   : > { %1985 = vpow2.f32 %v1860_v50 }
 0x21b   : > { %v1986_v37 = vpop.eup %1985 }
 0x21c   : > { %v1145_v36 = vadd.f32 1.0, %v1986_v37  ;;  %v2010_v37 = vld [vmem:[%s2356_s28 + $0x78] sm:$0xff] }
 0x21e   : > { %1987 = vrcp.f32 %v1145_v36 }
 0x22b   : > { %v1988_v38 = vpop.eup %1987 }
 0x22c   : > { %v1148_v4 = vmul.f32 %v1988_v38, %v1139_v6  ;;  %v2011_v38 = vld [vmem:[%s2356_s28 + $0xa0] sm:$0xff] }
 0x22e   : > { %1931 = vmatmul.mubr.msk.f32.vlgmr.msra.gmra.mxu1 %vm1157_vm3, %v1148_v4 }
 0x2ee   : > { %v1227_v11 = vpop.f32.mrf.mxu1 }
 0x2ef   : > { %v1228_v40 = vadd.f32 %v1861_v39, %v1227_v11  ;;  %v2012_v39 = vld [vmem:[%s2356_s28 + $0xa8] sm:$0xff] }
 0x2f0   : > { %v1932_v41 = vpop.f32.mrf.mxu1 }
 0x2f1   : > { %v1863_v52 = vmul.f32 -1.442695, %v1228_v40 }
 0x2f3   : > { %1989 = vpow2.f32 %v1863_v52  ;;  %v2013_v52 = vld [vmem:[%s2356_s28 + $0x90] sm:$0xff] }
 0x300   : > { %v1990_v9 = vpop.eup %1989 }
 0x301   : > { %v1234_v19 = vadd.f32 1.0, %v1990_v9 }
 0x303   : > { %1991 = vrcp.f32 %v1234_v19  ;;  %v2014_v19 = vld [vmem:[%s2356_s28 + $0x98] sm:$0xff] }
 0x310   : > { %v1992_v43 = vpop.eup %1991 }
 0x311   : > { %v1240_v53 = vrot.slane %v1992_v43, %v1239_v42  ;;  %v1307_v55 = vrot.slane %v1992_v43, %v1306_v5  ;;  %v1374_v62 = vrot.slane %v1992_v43, %v1373_v57  ;;  %v2908_v1 = vrot.slane %v1992_v43, %v1440_v63  ;;  %v2015_v43 = vld [vmem:[%s2356_s28 + $0xc0] sm:$0xff]  ;;  %v2016_v5 = vld [vmem:[%s2356_s28 + $0xc8] sm:$0xff]  ;;  %v2017_v63 = vld [vmem:[%s2356_s28 + $0xb0] sm:$0xff] }
 0x313   : > { %1246 = vbcast.lane.b32.xlu1 %v1240_v53, 264  ;;  %1242 = vbcast.lane.b32.xlu0 %v1240_v53, 256 }
 0x317   : > { %1250 = vbcast.lane.b32.xlu1 %v1240_v53, 272  ;;  %1258 = vbcast.lane.b32.xlu0 %v1240_v53, 288 }
 0x31b   : > { %1254 = vbcast.lane.b32.xlu1 %v1240_v53, 280  ;;  %1266 = vbcast.lane.b32.xlu0 %v1240_v53, 304 }
 0x31f   : > { %1262 = vbcast.lane.b32.xlu1 %v1240_v53, 296  ;;  %1274 = vbcast.lane.b32.xlu0 %v1240_v53, 320 }
 0x323   : > { %1270 = vbcast.lane.b32.xlu1 %v1240_v53, 312  ;;  %1282 = vbcast.lane.b32.xlu0 %v1240_v53, 336 }
 0x327   : > { %1278 = vbcast.lane.b32.xlu1 %v1240_v53, 328  ;;  %1290 = vbcast.lane.b32.xlu0 %v1240_v53, 352 }
 0x32b   : > { %1286 = vbcast.lane.b32.xlu1 %v1240_v53, 344  ;;  %1298 = vbcast.lane.b32.xlu0 %v1240_v53, 368 }
 0x32f   : > { %1294 = vbcast.lane.b32.xlu1 %v1240_v53, 360  ;;  %1309 = vbcast.lane.b32.xlu0 %v1307_v55, 256 }
 0x333   : > { %1302 = vbcast.lane.b32.xlu1 %v1240_v53, 376  ;;  %1317 = vbcast.lane.b32.xlu0 %v1307_v55, 272 }
 0x337   : > { %1313 = vbcast.lane.b32.xlu1 %v1307_v55, 264  ;;  %1325 = vbcast.lane.b32.xlu0 %v1307_v55, 288 }
 0x33b   : > { %1321 = vbcast.lane.b32.xlu1 %v1307_v55, 280  ;;  %1333 = vbcast.lane.b32.xlu0 %v1307_v55, 304 }
 0x33f   : > { %1329 = vbcast.lane.b32.xlu1 %v1307_v55, 296  ;;  %1341 = vbcast.lane.b32.xlu0 %v1307_v55, 320 }
 0x343   : > { %1337 = vbcast.lane.b32.xlu1 %v1307_v55, 312  ;;  %1349 = vbcast.lane.b32.xlu0 %v1307_v55, 336 }
 0x347   : > { %1345 = vbcast.lane.b32.xlu1 %v1307_v55, 328  ;;  %1357 = vbcast.lane.b32.xlu0 %v1307_v55, 352 }
 0x34b   : > { %1353 = vbcast.lane.b32.xlu1 %v1307_v55, 344  ;;  %1365 = vbcast.lane.b32.xlu0 %v1307_v55, 368 }
 0x34f   : > { %1361 = vbcast.lane.b32.xlu1 %v1307_v55, 360  ;;  %1376 = vbcast.lane.b32.xlu0 %v1374_v62, 256 }
 0x353   : > { %1369 = vbcast.lane.b32.xlu1 %v1307_v55, 376  ;;  %1384 = vbcast.lane.b32.xlu0 %v1374_v62, 272 }
 0x357   : > { %1380 = vbcast.lane.b32.xlu1 %v1374_v62, 264  ;;  %1392 = vbcast.lane.b32.xlu0 %v1374_v62, 288 }
 0x35b   : > { %1388 = vbcast.lane.b32.xlu1 %v1374_v62, 280  ;;  %1400 = vbcast.lane.b32.xlu0 %v1374_v62, 304 }
 0x35f   : > { %1396 = vbcast.lane.b32.xlu1 %v1374_v62, 296  ;;  %1408 = vbcast.lane.b32.xlu0 %v1374_v62, 320 }
 0x363   : > { %1404 = vbcast.lane.b32.xlu1 %v1374_v62, 312  ;;  %1416 = vbcast.lane.b32.xlu0 %v1374_v62, 336 }
 0x367   : > { %1412 = vbcast.lane.b32.xlu1 %v1374_v62, 328  ;;  %1424 = vbcast.lane.b32.xlu0 %v1374_v62, 352 }
 0x36b   : > { %1420 = vbcast.lane.b32.xlu1 %v1374_v62, 344  ;;  %1432 = vbcast.lane.b32.xlu0 %v1374_v62, 368 }
 0x36f   : > { %1428 = vbcast.lane.b32.xlu1 %v1374_v62, 360  ;;  %1443 = vbcast.lane.b32.xlu0 %v2908_v1, 256 }
 0x373   : > { %1436 = vbcast.lane.b32.xlu1 %v1374_v62, 376  ;;  %1451 = vbcast.lane.b32.xlu0 %v2908_v1, 272 }
 0x377   : > { %1447 = vbcast.lane.b32.xlu1 %v2908_v1, 264  ;;  %1459 = vbcast.lane.b32.xlu0 %v2908_v1, 288 }
 0x37b   : > { %1455 = vbcast.lane.b32.xlu1 %v2908_v1, 280  ;;  %1467 = vbcast.lane.b32.xlu0 %v2908_v1, 304 }
 0x37f   : > { %1463 = vbcast.lane.b32.xlu1 %v2908_v1, 296  ;;  %1475 = vbcast.lane.b32.xlu0 %v2908_v1, 320 }
 0x383   : > { %1471 = vbcast.lane.b32.xlu1 %v2908_v1, 312  ;;  %1483 = vbcast.lane.b32.xlu0 %v2908_v1, 336 }
 0x385   : > { %v1247_v56 = vpop.permute.xlu1 %1246  ;;  %v1243_v2 = vpop.permute.xlu0 %1242 }
 0x386   : > { %v1507_v44 = vmul.f32 %v1993_v15, %v1247_v56  ;;  %v1508_v14 = vmul.f32 %v1994_v27, %v1247_v56  ;;  %v1505_v22 = vmul.f32 %v1995_v28, %v1243_v2  ;;  %v1506_v23 = vmul.f32 %v1996_v0, %v1243_v2  ;;  %v2018_v56 = vld [vmem:[%s2356_s28 + $0xb8] sm:$0xff]  ;;  %v2019_v15 = vld [vmem:[%s2356_s28 + $0xe0] sm:$0xff]  ;;  %v2020_v27 = vld [vmem:[%s2356_s28 + $0xe8] sm:$0xff] }
 0x387   : > { %1479 = vbcast.lane.b32.xlu1 %v2908_v1, 328  ;;  %1491 = vbcast.lane.b32.xlu0 %v2908_v1, 352  ;;  %v2021_v0 = vld [vmem:[%s2356_s28 + $0xd0] sm:$0xff] }
 0x388   : > { %1635 = vst [vmem:[%s2928_s26 + $0x10] sm:$0xff] %v1507_v44  ;;  %1636 = vst [vmem:[%s2928_s26 + $0x18] sm:$0xff] %v1508_v14 }
 0x389   : > { %1633 = vst [vmem:[%s2928_s26] sm:$0xff] %v1505_v22  ;;  %1634 = vst [vmem:[%s2928_s26 + $0x8] sm:$0xff] %v1506_v23  ;;  %v1251_v46 = vpop.permute.xlu1 %1250  ;;  %v1259_v32 = vpop.permute.xlu0 %1258 }
 0x38a   : > { %v1509_v10 = vmul.f32 %v1997_v45, %v1251_v46  ;;  %v1510_v17 = vmul.f32 %v1998_v51, %v1251_v46  ;;  %v1513_v24 = vmul.f32 %v1999_v8, %v1259_v32  ;;  %v1514_v7 = vmul.f32 %v2000_v16, %v1259_v32  ;;  %v2022_v46 = vld [vmem:[%s2356_s28 + $0xd8] sm:$0xff]  ;;  %v2023_v45 = vld [vmem:[%s2356_s28 + $0x100] sm:$0xff]  ;;  %v2024_v51 = vld [vmem:[%s2356_s28 + $0x108] sm:$0xff] }
 0x38b   : > { %1487 = vbcast.lane.b32.xlu1 %v2908_v1, 344  ;;  %1499 = vbcast.lane.b32.xlu0 %v2908_v1, 368  ;;  %v2025_v16 = vld [vmem:[%s2356_s28 + $0xf0] sm:$0xff] }
 0x38c   : > { %1637 = vst [vmem:[%s2928_s26 + $0x20] sm:$0xff] %v1509_v10  ;;  %1638 = vst [vmem:[%s2928_s26 + $0x28] sm:$0xff] %v1510_v17 }
 0x38d   : > { %1641 = vst [vmem:[%s2928_s26 + $0x40] sm:$0xff] %v1513_v24  ;;  %1642 = vst [vmem:[%s2928_s26 + $0x48] sm:$0xff] %v1514_v7  ;;  %v1255_v12 = vpop.permute.xlu1 %1254  ;;  %v1267_v47 = vpop.permute.xlu0 %1266 }
 0x38e   : > { %v1511_v26 = vmul.f32 %v2001_v21, %v1255_v12  ;;  %v1512_v33 = vmul.f32 %v2002_v58, %v1255_v12  ;;  %v1517_v18 = vmul.f32 %v2003_v20, %v1267_v47  ;;  %v1518_v25 = vmul.f32 %v2004_v48, %v1267_v47  ;;  %v2026_v12 = vld [vmem:[%s2356_s28 + $0xf8] sm:$0xff]  ;;  %v2027_v21 = vld [vmem:[%s2356_s28 + $0x120] sm:$0xff]  ;;  %v2028_v58 = vld [vmem:[%s2356_s28 + $0x128] sm:$0xff] }
 0x38f   : > { %1495 = vbcast.lane.b32.xlu1 %v2908_v1, 360  ;;  %v2029_v48 = vld [vmem:[%s2356_s28 + $0x110] sm:$0xff] }
 0x390   : > { %1639 = vst [vmem:[%s2928_s26 + $0x30] sm:$0xff] %v1511_v26  ;;  %1640 = vst [vmem:[%s2928_s26 + $0x38] sm:$0xff] %v1512_v33 }
 0x391   : > { %1645 = vst [vmem:[%s2928_s26 + $0x60] sm:$0xff] %v1517_v18  ;;  %1646 = vst [vmem:[%s2928_s26 + $0x68] sm:$0xff] %v1518_v25  ;;  %v1263_v3 = vpop.permute.xlu1 %1262  ;;  %v1275_v60 = vpop.permute.xlu0 %1274 }
 0x392   : > { %v1515_v13 = vmul.f32 %v2005_v34, %v1263_v3  ;;  %v1516_v29 = vmul.f32 %v2006_v59, %v1263_v3  ;;  %v1521_v54 = vmul.f32 %v2007_v31, %v1275_v60  ;;  %v1522_v35 = vmul.f32 %v2008_v49, %v1275_v60  ;;  %v2030_v3 = vld [vmem:[%s2356_s28 + $0x118] sm:$0xff]  ;;  %v2031_v34 = vld [vmem:[%s2356_s28 + $0x140] sm:$0xff]  ;;  %v2032_v59 = vld [vmem:[%s2356_s28 + $0x148] sm:$0xff] }
 0x393   : > { %1503 = vbcast.lane.b32.xlu1 %v2908_v1, 376  ;;  %v2033_v49 = vld [vmem:[%s2356_s28 + $0x130] sm:$0xff] }
 0x394   : > { %1643 = vst [vmem:[%s2928_s26 + $0x50] sm:$0xff] %v1515_v13  ;;  %1644 = vst [vmem:[%s2928_s26 + $0x58] sm:$0xff] %v1516_v29 }
 0x395   : > { %1649 = vst [vmem:[%s2928_s26 + $0x80] sm:$0xff] %v1521_v54  ;;  %1650 = vst [vmem:[%s2928_s26 + $0x88] sm:$0xff] %v1522_v35  ;;  %v1271_v61 = vpop.permute.xlu1 %1270  ;;  %v1283_v6 = vpop.permute.xlu0 %1282 }
 0x396   : > { %v1519_v50 = vmul.f32 %v2009_v30, %v1271_v61  ;;  %v1520_v36 = vmul.f32 %v2010_v37, %v1271_v61  ;;  %v1525_v4 = vmul.f32 %v2011_v38, %v1283_v6  ;;  %v1526_v11 = vmul.f32 %v2012_v39, %v1283_v6  ;;  %v2034_v61 = vld [vmem:[%s2356_s28 + $0x138] sm:$0xff]  ;;  %v2035_v30 = vld [vmem:[%s2356_s28 + $0x160] sm:$0xff]  ;;  %v2036_v37 = vld [vmem:[%s2356_s28 + $0x168] sm:$0xff] }
 0x397   : > { %v2037_v39 = vld [vmem:[%s2356_s28 + $0x150] sm:$0xff] }
 0x398   : > { %1647 = vst [vmem:[%s2928_s26 + $0x70] sm:$0xff] %v1519_v50  ;;  %1648 = vst [vmem:[%s2928_s26 + $0x78] sm:$0xff] %v1520_v36 }
 0x399   : > { %1653 = vst [vmem:[%s2928_s26 + $0xa0] sm:$0xff] %v1525_v4  ;;  %1654 = vst [vmem:[%s2928_s26 + $0xa8] sm:$0xff] %v1526_v11  ;;  %v1279_v40 = vpop.permute.xlu1 %1278  ;;  %v1291_v41 = vpop.permute.xlu0 %1290 }
 0x39a   : > { %v1523_v9 = vmul.f32 %v2013_v52, %v1279_v40  ;;  %v1524_v42 = vmul.f32 %v2014_v19, %v1279_v40  ;;  %v1529_v53 = vmul.f32 %v2015_v43, %v1291_v41  ;;  %v1530_v55 = vmul.f32 %v2016_v5, %v1291_v41  ;;  %v2038_v40 = vld [vmem:[%s2356_s28 + $0x158] sm:$0xff]  ;;  %v2039_v52 = vld [vmem:[%s2356_s28 + $0x180] sm:$0xff]  ;;  %v2040_v19 = vld [vmem:[%s2356_s28 + $0x188] sm:$0xff] }
 0x39b   : > { %v2041_v5 = vld [vmem:[%s2356_s28 + $0x170] sm:$0xff] }
 0x39c   : > { %1651 = vst [vmem:[%s2928_s26 + $0x90] sm:$0xff] %v1523_v9  ;;  %1652 = vst [vmem:[%s2928_s26 + $0x98] sm:$0xff] %v1524_v42 }
 0x39d   : > { %1657 = vst [vmem:[%s2928_s26 + $0xc0] sm:$0xff] %v1529_v53  ;;  %1658 = vst [vmem:[%s2928_s26 + $0xc8] sm:$0xff] %v1530_v55  ;;  %v1287_v57 = vpop.permute.xlu1 %1286  ;;  %v1299_v62 = vpop.permute.xlu0 %1298 }
 0x39e   : > { %v1527_v1 = vmul.f32 %v2017_v63, %v1287_v57  ;;  %v1528_v2 = vmul.f32 %v2018_v56, %v1287_v57  ;;  %v1533_v44 = vmul.f32 %v2019_v15, %v1299_v62  ;;  %v1534_v14 = vmul.f32 %v2020_v27, %v1299_v62  ;;  %v2042_v57 = vld [vmem:[%s2356_s28 + $0x178] sm:$0xff]  ;;  %v2043_v63 = vld [vmem:[%s2356_s28 + $0x1a0] sm:$0xff]  ;;  %v2044_v56 = vld [vmem:[%s2356_s28 + $0x1a8] sm:$0xff] }
 0x39f   : > { %v2045_v27 = vld [vmem:[%s2356_s28 + $0x190] sm:$0xff] }
 0x3a0   : > { %1655 = vst [vmem:[%s2928_s26 + $0xb0] sm:$0xff] %v1527_v1  ;;  %1656 = vst [vmem:[%s2928_s26 + $0xb8] sm:$0xff] %v1528_v2 }
 0x3a1   : > { %1661 = vst [vmem:[%s2928_s26 + $0xe0] sm:$0xff] %v1533_v44  ;;  %1662 = vst [vmem:[%s2928_s26 + $0xe8] sm:$0xff] %v1534_v14  ;;  %v1295_v28 = vpop.permute.xlu1 %1294  ;;  %v1310_v22 = vpop.permute.xlu0 %1309 }
 0x3a2   : > { %v1531_v23 = vmul.f32 %v2021_v0, %v1295_v28  ;;  %v1532_v32 = vmul.f32 %v2022_v46, %v1295_v28  ;;  %v1537_v10 = vmul.f32 %v2023_v45, %v1310_v22  ;;  %v1538_v17 = vmul.f32 %v2024_v51, %v1310_v22  ;;  %v2046_v28 = vld [vmem:[%s2356_s28 + $0x198] sm:$0xff]  ;;  %v2047_v0 = vld [vmem:[%s2356_s28 + $0x1c0] sm:$0xff]  ;;  %v2048_v46 = vld [vmem:[%s2356_s28 + $0x1c8] sm:$0xff] }
 0x3a3   : > { %v2049_v51 = vld [vmem:[%s2356_s28 + $0x1b0] sm:$0xff] }
 0x3a4   : > { %1659 = vst [vmem:[%s2928_s26 + $0xd0] sm:$0xff] %v1531_v23  ;;  %1660 = vst [vmem:[%s2928_s26 + $0xd8] sm:$0xff] %v1532_v32 }
 0x3a5   : > { %1665 = vst [vmem:[%s2928_s26 + $0x100] sm:$0xff] %v1537_v10  ;;  %1666 = vst [vmem:[%s2928_s26 + $0x108] sm:$0xff] %v1538_v17  ;;  %v1303_v8 = vpop.permute.xlu1 %1302  ;;  %v1318_v24 = vpop.permute.xlu0 %1317 }
 0x3a6   : > { %v1535_v7 = vmul.f32 %v2025_v16, %v1303_v8  ;;  %v1536_v47 = vmul.f32 %v2026_v12, %v1303_v8  ;;  %v1541_v26 = vmul.f32 %v2027_v21, %v1318_v24  ;;  %v1542_v33 = vmul.f32 %v2028_v58, %v1318_v24  ;;  %v2050_v8 = vld [vmem:[%s2356_s28 + $0x1b8] sm:$0xff]  ;;  %v2051_v16 = vld [vmem:[%s2356_s28 + $0x1e0] sm:$0xff]  ;;  %v2052_v12 = vld [vmem:[%s2356_s28 + $0x1e8] sm:$0xff] }
 0x3a7   : > { %v2053_v58 = vld [vmem:[%s2356_s28 + $0x1d0] sm:$0xff] }
 0x3a8   : > { %1663 = vst [vmem:[%s2928_s26 + $0xf0] sm:$0xff] %v1535_v7  ;;  %1664 = vst [vmem:[%s2928_s26 + $0xf8] sm:$0xff] %v1536_v47 }
 0x3a9   : > { %1669 = vst [vmem:[%s2928_s26 + $0x120] sm:$0xff] %v1541_v26  ;;  %1670 = vst [vmem:[%s2928_s26 + $0x128] sm:$0xff] %v1542_v33  ;;  %v1314_v20 = vpop.permute.xlu1 %1313  ;;  %v1326_v18 = vpop.permute.xlu0 %1325 }
 0x3aa   : > { %v1539_v25 = vmul.f32 %v2029_v48, %v1314_v20  ;;  %v1540_v60 = vmul.f32 %v2030_v3, %v1314_v20  ;;  %v1545_v13 = vmul.f32 %v2031_v34, %v1326_v18  ;;  %v1546_v29 = vmul.f32 %v2032_v59, %v1326_v18  ;;  %v2054_v20 = vld [vmem:[%s2356_s28 + $0x1d8] sm:$0xff]  ;;  %v2055_v48 = vld [vmem:[%s2356_s28 + $0x200] sm:$0xff]  ;;  %v2056_v3 = vld [vmem:[%s2356_s28 + $0x208] sm:$0xff] }
 0x3ab   : > { %v2057_v59 = vld [vmem:[%s2356_s28 + $0x1f0] sm:$0xff] }
 0x3ac   : > { %1667 = vst [vmem:[%s2928_s26 + $0x110] sm:$0xff] %v1539_v25  ;;  %1668 = vst [vmem:[%s2928_s26 + $0x118] sm:$0xff] %v1540_v60 }
 0x3ad   : > { %1673 = vst [vmem:[%s2928_s26 + $0x140] sm:$0xff] %v1545_v13  ;;  %1674 = vst [vmem:[%s2928_s26 + $0x148] sm:$0xff] %v1546_v29  ;;  %v1322_v31 = vpop.permute.xlu1 %1321  ;;  %v1334_v54 = vpop.permute.xlu0 %1333 }
 0x3ae   : > { %v1543_v35 = vmul.f32 %v2033_v49, %v1322_v31  ;;  %v1544_v6 = vmul.f32 %v2034_v61, %v1322_v31  ;;  %v1549_v50 = vmul.f32 %v2035_v30, %v1334_v54  ;;  %v1550_v36 = vmul.f32 %v2036_v37, %v1334_v54  ;;  %v2058_v31 = vld [vmem:[%s2356_s28 + $0x1f8] sm:$0xff]  ;;  %v2059_v49 = vld [vmem:[%s2356_s28 + $0x220] sm:$0xff]  ;;  %v2060_v61 = vld [vmem:[%s2356_s28 + $0x228] sm:$0xff] }
 0x3af   : > { %v2061_v37 = vld [vmem:[%s2356_s28 + $0x210] sm:$0xff] }
 0x3b0   : > { %1671 = vst [vmem:[%s2928_s26 + $0x130] sm:$0xff] %v1543_v35  ;;  %1672 = vst [vmem:[%s2928_s26 + $0x138] sm:$0xff] %v1544_v6 }
 0x3b1   : > { %1677 = vst [vmem:[%s2928_s26 + $0x160] sm:$0xff] %v1549_v50  ;;  %1678 = vst [vmem:[%s2928_s26 + $0x168] sm:$0xff] %v1550_v36  ;;  %v1330_v38 = vpop.permute.xlu1 %1329  ;;  %v1342_v4 = vpop.permute.xlu0 %1341 }
 0x3b2   : > { %v1547_v11 = vmul.f32 %v2037_v39, %v1330_v38  ;;  %v1548_v41 = vmul.f32 %v2038_v40, %v1330_v38  ;;  %v1553_v9 = vmul.f32 %v2039_v52, %v1342_v4  ;;  %v1554_v42 = vmul.f32 %v2040_v19, %v1342_v4  ;;  %v2062_v38 = vld [vmem:[%s2356_s28 + $0x218] sm:$0xff]  ;;  %v2063_v39 = vld [vmem:[%s2356_s28 + $0x240] sm:$0xff]  ;;  %v2064_v40 = vld [vmem:[%s2356_s28 + $0x248] sm:$0xff] }
 0x3b3   : > { %v2065_v19 = vld [vmem:[%s2356_s28 + $0x230] sm:$0xff] }
 0x3b4   : > { %1675 = vst [vmem:[%s2928_s26 + $0x150] sm:$0xff] %v1547_v11  ;;  %1676 = vst [vmem:[%s2928_s26 + $0x158] sm:$0xff] %v1548_v41 }
 0x3b5   : > { %1681 = vst [vmem:[%s2928_s26 + $0x180] sm:$0xff] %v1553_v9  ;;  %1682 = vst [vmem:[%s2928_s26 + $0x188] sm:$0xff] %v1554_v42  ;;  %v1338_v43 = vpop.permute.xlu1 %1337  ;;  %v1350_v53 = vpop.permute.xlu0 %1349 }
 0x3b6   : > { %v1551_v55 = vmul.f32 %v2041_v5, %v1338_v43  ;;  %v1552_v62 = vmul.f32 %v2042_v57, %v1338_v43  ;;  %v1557_v1 = vmul.f32 %v2043_v63, %v1350_v53  ;;  %v1558_v2 = vmul.f32 %v2044_v56, %v1350_v53  ;;  %v2066_v43 = vld [vmem:[%s2356_s28 + $0x238] sm:$0xff]  ;;  %v2067_v5 = vld [vmem:[%s2356_s28 + $0x260] sm:$0xff]  ;;  %v2068_v57 = vld [vmem:[%s2356_s28 + $0x268] sm:$0xff] }
 0x3b7   : > { %v2069_v56 = vld [vmem:[%s2356_s28 + $0x250] sm:$0xff] }
 0x3b8   : > { %1679 = vst [vmem:[%s2928_s26 + $0x170] sm:$0xff] %v1551_v55  ;;  %1680 = vst [vmem:[%s2928_s26 + $0x178] sm:$0xff] %v1552_v62 }
 0x3b9   : > { %1685 = vst [vmem:[%s2928_s26 + $0x1a0] sm:$0xff] %v1557_v1  ;;  %1686 = vst [vmem:[%s2928_s26 + $0x1a8] sm:$0xff] %v1558_v2  ;;  %v1346_v15 = vpop.permute.xlu1 %1345  ;;  %v1358_v44 = vpop.permute.xlu0 %1357 }
 0x3ba   : > { %v1555_v14 = vmul.f32 %v2045_v27, %v1346_v15  ;;  %v1556_v22 = vmul.f32 %v2046_v28, %v1346_v15  ;;  %v1561_v23 = vmul.f32 %v2047_v0, %v1358_v44  ;;  %v1562_v32 = vmul.f32 %v2048_v46, %v1358_v44  ;;  %v2070_v15 = vld [vmem:[%s2356_s28 + $0x258] sm:$0xff]  ;;  %v2071_v27 = vld [vmem:[%s2356_s28 + $0x280] sm:$0xff]  ;;  %v2072_v28 = vld [vmem:[%s2356_s28 + $0x288] sm:$0xff] }
 0x3bb   : > { %v2073_v46 = vld [vmem:[%s2356_s28 + $0x270] sm:$0xff] }
 0x3bc   : > { %1683 = vst [vmem:[%s2928_s26 + $0x190] sm:$0xff] %v1555_v14  ;;  %1684 = vst [vmem:[%s2928_s26 + $0x198] sm:$0xff] %v1556_v22 }
 0x3bd   : > { %1689 = vst [vmem:[%s2928_s26 + $0x1c0] sm:$0xff] %v1561_v23  ;;  %1690 = vst [vmem:[%s2928_s26 + $0x1c8] sm:$0xff] %v1562_v32  ;;  %v1354_v45 = vpop.permute.xlu1 %1353  ;;  %v1366_v10 = vpop.permute.xlu0 %1365 }
 0x3be   : > { %v1559_v17 = vmul.f32 %v2049_v51, %v1354_v45  ;;  %v1560_v24 = vmul.f32 %v2050_v8, %v1354_v45  ;;  %v1565_v7 = vmul.f32 %v2051_v16, %v1366_v10  ;;  %v1566_v47 = vmul.f32 %v2052_v12, %v1366_v10  ;;  %v2074_v45 = vld [vmem:[%s2356_s28 + $0x278] sm:$0xff]  ;;  %v2075_v51 = vld [vmem:[%s2356_s28 + $0x2a0] sm:$0xff]  ;;  %v2076_v8 = vld [vmem:[%s2356_s28 + $0x2a8] sm:$0xff] }
 0x3bf   : > { %v2077_v12 = vld [vmem:[%s2356_s28 + $0x290] sm:$0xff] }
 0x3c0   : > { %1687 = vst [vmem:[%s2928_s26 + $0x1b0] sm:$0xff] %v1559_v17  ;;  %1688 = vst [vmem:[%s2928_s26 + $0x1b8] sm:$0xff] %v1560_v24 }
 0x3c1   : > { %1693 = vst [vmem:[%s2928_s26 + $0x1e0] sm:$0xff] %v1565_v7  ;;  %1694 = vst [vmem:[%s2928_s26 + $0x1e8] sm:$0xff] %v1566_v47  ;;  %v1362_v21 = vpop.permute.xlu1 %1361  ;;  %v1377_v26 = vpop.permute.xlu0 %1376 }
 0x3c2   : > { %v1563_v33 = vmul.f32 %v2053_v58, %v1362_v21  ;;  %v1564_v18 = vmul.f32 %v2054_v20, %v1362_v21  ;;  %v1569_v25 = vmul.f32 %v2055_v48, %v1377_v26  ;;  %v1570_v60 = vmul.f32 %v2056_v3, %v1377_v26  ;;  %v2078_v21 = vld [vmem:[%s2356_s28 + $0x298] sm:$0xff]  ;;  %v2079_v58 = vld [vmem:[%s2356_s28 + $0x2c0] sm:$0xff]  ;;  %v2080_v20 = vld [vmem:[%s2356_s28 + $0x2c8] sm:$0xff] }
 0x3c3   : > { %v2081_v3 = vld [vmem:[%s2356_s28 + $0x2b0] sm:$0xff] }
 0x3c4   : > { %1691 = vst [vmem:[%s2928_s26 + $0x1d0] sm:$0xff] %v1563_v33  ;;  %1692 = vst [vmem:[%s2928_s26 + $0x1d8] sm:$0xff] %v1564_v18 }
 0x3c5   : > { %1697 = vst [vmem:[%s2928_s26 + $0x200] sm:$0xff] %v1569_v25  ;;  %1698 = vst [vmem:[%s2928_s26 + $0x208] sm:$0xff] %v1570_v60  ;;  %v1370_v34 = vpop.permute.xlu1 %1369  ;;  %v1385_v13 = vpop.permute.xlu0 %1384 }
 0x3c6   : > { %v1567_v29 = vmul.f32 %v2057_v59, %v1370_v34  ;;  %v1568_v54 = vmul.f32 %v2058_v31, %v1370_v34  ;;  %v1573_v35 = vmul.f32 %v2059_v49, %v1385_v13  ;;  %v1574_v6 = vmul.f32 %v2060_v61, %v1385_v13  ;;  %v2082_v34 = vld [vmem:[%s2356_s28 + $0x2b8] sm:$0xff]  ;;  %v2083_v59 = vld [vmem:[%s2356_s28 + $0x2e0] sm:$0xff]  ;;  %v2084_v31 = vld [vmem:[%s2356_s28 + $0x2e8] sm:$0xff] }
 0x3c7   : > { %v2085_v61 = vld [vmem:[%s2356_s28 + $0x2d0] sm:$0xff] }
 0x3c8   : > { %1695 = vst [vmem:[%s2928_s26 + $0x1f0] sm:$0xff] %v1567_v29  ;;  %1696 = vst [vmem:[%s2928_s26 + $0x1f8] sm:$0xff] %v1568_v54 }
 0x3c9   : > { %1701 = vst [vmem:[%s2928_s26 + $0x220] sm:$0xff] %v1573_v35  ;;  %1702 = vst [vmem:[%s2928_s26 + $0x228] sm:$0xff] %v1574_v6  ;;  %v1381_v30 = vpop.permute.xlu1 %1380  ;;  %v1393_v50 = vpop.permute.xlu0 %1392 }
 0x3ca   : > { %v1571_v36 = vmul.f32 %v2061_v37, %v1381_v30  ;;  %v1572_v4 = vmul.f32 %v2062_v38, %v1381_v30  ;;  %v1577_v11 = vmul.f32 %v2063_v39, %v1393_v50  ;;  %v1578_v41 = vmul.f32 %v2064_v40, %v1393_v50  ;;  %v2086_v30 = vld [vmem:[%s2356_s28 + $0x2d8] sm:$0xff]  ;;  %v2087_v37 = vld [vmem:[%s2356_s28 + $0x300] sm:$0xff]  ;;  %v2088_v38 = vld [vmem:[%s2356_s28 + $0x308] sm:$0xff] }
 0x3cb   : > { %v2089_v40 = vld [vmem:[%s2356_s28 + $0x2f0] sm:$0xff] }
 0x3cc   : > { %1699 = vst [vmem:[%s2928_s26 + $0x210] sm:$0xff] %v1571_v36  ;;  %1700 = vst [vmem:[%s2928_s26 + $0x218] sm:$0xff] %v1572_v4 }
 0x3cd   : > { %1705 = vst [vmem:[%s2928_s26 + $0x240] sm:$0xff] %v1577_v11  ;;  %1706 = vst [vmem:[%s2928_s26 + $0x248] sm:$0xff] %v1578_v41  ;;  %v1389_v52 = vpop.permute.xlu1 %1388  ;;  %v1401_v9 = vpop.permute.xlu0 %1400 }
 0x3ce   : > { %v1575_v42 = vmul.f32 %v2065_v19, %v1389_v52  ;;  %v1576_v53 = vmul.f32 %v2066_v43, %v1389_v52  ;;  %v1581_v55 = vmul.f32 %v2067_v5, %v1401_v9  ;;  %v1582_v62 = vmul.f32 %v2068_v57, %v1401_v9  ;;  %v2090_v52 = vld [vmem:[%s2356_s28 + $0x2f8] sm:$0xff]  ;;  %v2091_v19 = vld [vmem:[%s2356_s28 + $0x320] sm:$0xff]  ;;  %v2092_v43 = vld [vmem:[%s2356_s28 + $0x328] sm:$0xff] }
 0x3cf   : > { %v2093_v57 = vld [vmem:[%s2356_s28 + $0x310] sm:$0xff] }
 0x3d0   : > { %1703 = vst [vmem:[%s2928_s26 + $0x230] sm:$0xff] %v1575_v42  ;;  %1704 = vst [vmem:[%s2928_s26 + $0x238] sm:$0xff] %v1576_v53 }
 0x3d1   : > { %1709 = vst [vmem:[%s2928_s26 + $0x260] sm:$0xff] %v1581_v55  ;;  %1710 = vst [vmem:[%s2928_s26 + $0x268] sm:$0xff] %v1582_v62  ;;  %v1397_v63 = vpop.permute.xlu1 %1396  ;;  %v1409_v1 = vpop.permute.xlu0 %1408 }
 0x3d2   : > { %v1579_v2 = vmul.f32 %v2069_v56, %v1397_v63  ;;  %v1580_v44 = vmul.f32 %v2070_v15, %v1397_v63  ;;  %v1585_v14 = vmul.f32 %v2071_v27, %v1409_v1  ;;  %v1586_v22 = vmul.f32 %v2072_v28, %v1409_v1  ;;  %v2094_v63 = vld [vmem:[%s2356_s28 + $0x318] sm:$0xff]  ;;  %v2095_v56 = vld [vmem:[%s2356_s28 + $0x340] sm:$0xff]  ;;  %v2096_v15 = vld [vmem:[%s2356_s28 + $0x348] sm:$0xff] }
 0x3d3   : > { %v2097_v28 = vld [vmem:[%s2356_s28 + $0x330] sm:$0xff] }
 0x3d4   : > { %1707 = vst [vmem:[%s2928_s26 + $0x250] sm:$0xff] %v1579_v2  ;;  %1708 = vst [vmem:[%s2928_s26 + $0x258] sm:$0xff] %v1580_v44 }
 0x3d5   : > { %1713 = vst [vmem:[%s2928_s26 + $0x280] sm:$0xff] %v1585_v14  ;;  %1714 = vst [vmem:[%s2928_s26 + $0x288] sm:$0xff] %v1586_v22  ;;  %v1405_v0 = vpop.permute.xlu1 %1404  ;;  %v1417_v23 = vpop.permute.xlu0 %1416 }
 0x3d6   : > { %v1583_v32 = vmul.f32 %v2073_v46, %v1405_v0  ;;  %v1584_v10 = vmul.f32 %v2074_v45, %v1405_v0  ;;  %v1589_v17 = vmul.f32 %v2075_v51, %v1417_v23  ;;  %v1590_v24 = vmul.f32 %v2076_v8, %v1417_v23  ;;  %v2098_v0 = vld [vmem:[%s2356_s28 + $0x338] sm:$0xff]  ;;  %v2099_v46 = vld [vmem:[%s2356_s28 + $0x360] sm:$0xff]  ;;  %v2100_v45 = vld [vmem:[%s2356_s28 + $0x368] sm:$0xff] }
 0x3d7   : > { %v2101_v8 = vld [vmem:[%s2356_s28 + $0x350] sm:$0xff] }
 0x3d8   : > { %1711 = vst [vmem:[%s2928_s26 + $0x270] sm:$0xff] %v1583_v32  ;;  %1712 = vst [vmem:[%s2928_s26 + $0x278] sm:$0xff] %v1584_v10 }
 0x3d9   : > { %1717 = vst [vmem:[%s2928_s26 + $0x2a0] sm:$0xff] %v1589_v17  ;;  %1718 = vst [vmem:[%s2928_s26 + $0x2a8] sm:$0xff] %v1590_v24  ;;  %v1413_v16 = vpop.permute.xlu1 %1412  ;;  %v1425_v7 = vpop.permute.xlu0 %1424 }
 0x3da   : > { %v1587_v47 = vmul.f32 %v2077_v12, %v1413_v16  ;;  %v1588_v26 = vmul.f32 %v2078_v21, %v1413_v16  ;;  %v1593_v33 = vmul.f32 %v2079_v58, %v1425_v7  ;;  %v1594_v18 = vmul.f32 %v2080_v20, %v1425_v7  ;;  %v2102_v16 = vld [vmem:[%s2356_s28 + $0x358] sm:$0xff]  ;;  %v2103_v12 = vld [vmem:[%s2356_s28 + $0x380] sm:$0xff]  ;;  %v2104_v21 = vld [vmem:[%s2356_s28 + $0x388] sm:$0xff] }
 0x3db   : > { %v2105_v20 = vld [vmem:[%s2356_s28 + $0x370] sm:$0xff] }
 0x3dc   : > { %1715 = vst [vmem:[%s2928_s26 + $0x290] sm:$0xff] %v1587_v47  ;;  %1716 = vst [vmem:[%s2928_s26 + $0x298] sm:$0xff] %v1588_v26 }
 0x3dd   : > { %1721 = vst [vmem:[%s2928_s26 + $0x2c0] sm:$0xff] %v1593_v33  ;;  %1722 = vst [vmem:[%s2928_s26 + $0x2c8] sm:$0xff] %v1594_v18  ;;  %v1421_v48 = vpop.permute.xlu1 %1420  ;;  %v1433_v25 = vpop.permute.xlu0 %1432 }
 0x3de   : > { %v1591_v60 = vmul.f32 %v2081_v3, %v1421_v48  ;;  %v1592_v13 = vmul.f32 %v2082_v34, %v1421_v48  ;;  %v1597_v29 = vmul.f32 %v2083_v59, %v1433_v25  ;;  %v1598_v54 = vmul.f32 %v2084_v31, %v1433_v25  ;;  %v2106_v48 = vld [vmem:[%s2356_s28 + $0x378] sm:$0xff]  ;;  %v2107_v3 = vld [vmem:[%s2356_s28 + $0x3a0] sm:$0xff]  ;;  %v2108_v34 = vld [vmem:[%s2356_s28 + $0x3a8] sm:$0xff] }
 0x3df   : > { %v2109_v31 = vld [vmem:[%s2356_s28 + $0x390] sm:$0xff] }
 0x3e0   : > { %1719 = vst [vmem:[%s2928_s26 + $0x2b0] sm:$0xff] %v1591_v60  ;;  %1720 = vst [vmem:[%s2928_s26 + $0x2b8] sm:$0xff] %v1592_v13 }
 0x3e1   : > { %1725 = vst [vmem:[%s2928_s26 + $0x2e0] sm:$0xff] %v1597_v29  ;;  %1726 = vst [vmem:[%s2928_s26 + $0x2e8] sm:$0xff] %v1598_v54  ;;  %v1429_v49 = vpop.permute.xlu1 %1428  ;;  %v1444_v35 = vpop.permute.xlu0 %1443 }
 0x3e2   : > { %v1595_v6 = vmul.f32 %v2085_v61, %v1429_v49  ;;  %v1596_v50 = vmul.f32 %v2086_v30, %v1429_v49  ;;  %v1601_v36 = vmul.f32 %v2087_v37, %v1444_v35  ;;  %v1602_v4 = vmul.f32 %v2088_v38, %v1444_v35  ;;  %v2110_v49 = vld [vmem:[%s2356_s28 + $0x398] sm:$0xff]  ;;  %v2111_v61 = vld [vmem:[%s2356_s28 + $0x3c0] sm:$0xff]  ;;  %v2112_v30 = vld [vmem:[%s2356_s28 + $0x3c8] sm:$0xff] }
 0x3e3   : > { %v2113_v38 = vld [vmem:[%s2356_s28 + $0x3b0] sm:$0xff] }
 0x3e4   : > { %1723 = vst [vmem:[%s2928_s26 + $0x2d0] sm:$0xff] %v1595_v6  ;;  %1724 = vst [vmem:[%s2928_s26 + $0x2d8] sm:$0xff] %v1596_v50 }
 0x3e5   : > { %1729 = vst [vmem:[%s2928_s26 + $0x300] sm:$0xff] %v1601_v36  ;;  %1730 = vst [vmem:[%s2928_s26 + $0x308] sm:$0xff] %v1602_v4  ;;  %v1437_v39 = vpop.permute.xlu1 %1436  ;;  %v1452_v11 = vpop.permute.xlu0 %1451 }
 0x3e6   : > { %v1599_v41 = vmul.f32 %v2089_v40, %v1437_v39  ;;  %v1600_v9 = vmul.f32 %v2090_v52, %v1437_v39  ;;  %v1605_v42 = vmul.f32 %v2091_v19, %v1452_v11  ;;  %v1606_v53 = vmul.f32 %v2092_v43, %v1452_v11  ;;  %v2114_v39 = vld [vmem:[%s2356_s28 + $0x3b8] sm:$0xff]  ;;  %v2115_v40 = vld [vmem:[%s2356_s28 + $0x3e0] sm:$0xff]  ;;  %v2116_v52 = vld [vmem:[%s2356_s28 + $0x3e8] sm:$0xff] }
 0x3e8   : > { %1727 = vst [vmem:[%s2928_s26 + $0x2f0] sm:$0xff] %v1599_v41  ;;  %1728 = vst [vmem:[%s2928_s26 + $0x2f8] sm:$0xff] %v1600_v9 }
 0x3e9   : > { %1733 = vst [vmem:[%s2928_s26 + $0x320] sm:$0xff] %v1605_v42  ;;  %1734 = vst [vmem:[%s2928_s26 + $0x328] sm:$0xff] %v1606_v53  ;;  %v1448_v5 = vpop.permute.xlu1 %1447  ;;  %v1460_v55 = vpop.permute.xlu0 %1459  ;;  %v2117_v42 = vld [vmem:[%s2356_s28 + $0x3d0] sm:$0xff]  ;;  %v2118_v53 = vld [vmem:[%s2356_s28 + $0x3d8] sm:$0xff] }
 0x3ea   : > { %v1603_v62 = vmul.f32 %v2093_v57, %v1448_v5  ;;  %v1604_v1 = vmul.f32 %v2094_v63, %v1448_v5  ;;  %v1609_v2 = vmul.f32 %v2095_v56, %v1460_v55  ;;  %v1610_v44 = vmul.f32 %v2096_v15, %v1460_v55  ;;  %v2119_v57 = vld [vmem:[%s2356_s28 + $0x3f0] sm:$0xff]  ;;  %v2120_v63 = vld [vmem:[%s2356_s28 + $0x3f8] sm:$0xff] }
 0x3ec   : > { %1731 = vst [vmem:[%s2928_s26 + $0x310] sm:$0xff] %v1603_v62  ;;  %1732 = vst [vmem:[%s2928_s26 + $0x318] sm:$0xff] %v1604_v1 }
 0x3ed   : > { %1737 = vst [vmem:[%s2928_s26 + $0x340] sm:$0xff] %v1609_v2  ;;  %1738 = vst [vmem:[%s2928_s26 + $0x348] sm:$0xff] %v1610_v44  ;;  %v1456_v27 = vpop.permute.xlu1 %1455  ;;  %v1468_v14 = vpop.permute.xlu0 %1467 }
 0x3ee   : > { %v1607_v22 = vmul.f32 %v2097_v28, %v1456_v27  ;;  %v1608_v23 = vmul.f32 %v2098_v0, %v1456_v27  ;;  %v1613_v32 = vmul.f32 %v2099_v46, %v1468_v14  ;;  %v1614_v10 = vmul.f32 %v2100_v45, %v1468_v14 }
 0x3f0   : > { %1735 = vst [vmem:[%s2928_s26 + $0x330] sm:$0xff] %v1607_v22  ;;  %1736 = vst [vmem:[%s2928_s26 + $0x338] sm:$0xff] %v1608_v23 }
 0x3f1   : > { %1741 = vst [vmem:[%s2928_s26 + $0x360] sm:$0xff] %v1613_v32  ;;  %1742 = vst [vmem:[%s2928_s26 + $0x368] sm:$0xff] %v1614_v10  ;;  %v1464_v51 = vpop.permute.xlu1 %1463  ;;  %v1476_v17 = vpop.permute.xlu0 %1475 }
 0x3f2   : > { %v1611_v24 = vmul.f32 %v2101_v8, %v1464_v51  ;;  %v1612_v7 = vmul.f32 %v2102_v16, %v1464_v51  ;;  %v1617_v47 = vmul.f32 %v2103_v12, %v1476_v17  ;;  %v1618_v26 = vmul.f32 %v2104_v21, %v1476_v17 }
 0x3f4   : > { %1739 = vst [vmem:[%s2928_s26 + $0x350] sm:$0xff] %v1611_v24  ;;  %1740 = vst [vmem:[%s2928_s26 + $0x358] sm:$0xff] %v1612_v7 }
 0x3f5   : > { %1745 = vst [vmem:[%s2928_s26 + $0x380] sm:$0xff] %v1617_v47  ;;  %1746 = vst [vmem:[%s2928_s26 + $0x388] sm:$0xff] %v1618_v26  ;;  %v1472_v58 = vpop.permute.xlu1 %1471  ;;  %v1484_v33 = vpop.permute.xlu0 %1483 }
 0x3f6   : > { %v1615_v18 = vmul.f32 %v2105_v20, %v1472_v58  ;;  %v1616_v25 = vmul.f32 %v2106_v48, %v1472_v58  ;;  %v1621_v60 = vmul.f32 %v2107_v3, %v1484_v33  ;;  %v1622_v13 = vmul.f32 %v2108_v34, %v1484_v33 }
 0x3f8   : > { %1743 = vst [vmem:[%s2928_s26 + $0x370] sm:$0xff] %v1615_v18  ;;  %1744 = vst [vmem:[%s2928_s26 + $0x378] sm:$0xff] %v1616_v25 }
 0x3f9   : > { %1749 = vst [vmem:[%s2928_s26 + $0x3a0] sm:$0xff] %v1621_v60  ;;  %1750 = vst [vmem:[%s2928_s26 + $0x3a8] sm:$0xff] %v1622_v13  ;;  %v1480_v59 = vpop.permute.xlu1 %1479  ;;  %v1492_v29 = vpop.permute.xlu0 %1491 }
 0x3fa   : > { %v1619_v54 = vmul.f32 %v2109_v31, %v1480_v59  ;;  %v1620_v35 = vmul.f32 %v2110_v49, %v1480_v59  ;;  %v1625_v6 = vmul.f32 %v2111_v61, %v1492_v29  ;;  %v1626_v50 = vmul.f32 %v2112_v30, %v1492_v29 }
 0x3fc   : > { %1747 = vst [vmem:[%s2928_s26 + $0x390] sm:$0xff] %v1619_v54  ;;  %1748 = vst [vmem:[%s2928_s26 + $0x398] sm:$0xff] %v1620_v35 }
 0x3fd   : > { %1753 = vst [vmem:[%s2928_s26 + $0x3c0] sm:$0xff] %v1625_v6  ;;  %1754 = vst [vmem:[%s2928_s26 + $0x3c8] sm:$0xff] %v1626_v50  ;;  %v1488_v37 = vpop.permute.xlu1 %1487  ;;  %v1500_v36 = vpop.permute.xlu0 %1499 }
 0x3fe   : > { %v1623_v4 = vmul.f32 %v2113_v38, %v1488_v37  ;;  %v1624_v11 = vmul.f32 %v2114_v39, %v1488_v37  ;;  %v1629_v41 = vmul.f32 %v2115_v40, %v1500_v36  ;;  %v1630_v9 = vmul.f32 %v2116_v52, %v1500_v36 }
 0x400   : > { %1751 = vst [vmem:[%s2928_s26 + $0x3b0] sm:$0xff] %v1623_v4  ;;  %1752 = vst [vmem:[%s2928_s26 + $0x3b8] sm:$0xff] %v1624_v11 }
 0x401   : > { %1757 = vst [vmem:[%s2928_s26 + $0x3e0] sm:$0xff] %v1629_v41  ;;  %1758 = vst [vmem:[%s2928_s26 + $0x3e8] sm:$0xff] %v1630_v9  ;;  %v1496_v19 = vpop.permute.xlu1 %1495 }
 0x402   : > { %v1627_v43 = vmul.f32 %v2117_v42, %v1496_v19  ;;  %v1628_v5 = vmul.f32 %v2118_v53, %v1496_v19 }
 0x404   : > { %1755 = vst [vmem:[%s2928_s26 + $0x3d0] sm:$0xff] %v1627_v43  ;;  %1756 = vst [vmem:[%s2928_s26 + $0x3d8] sm:$0xff] %v1628_v5 }
 0x405   : > { %v1504_v55 = vpop.permute.xlu1 %1503 }
 0x406   : > { %v1631_v62 = vmul.f32 %v2119_v57, %v1504_v55  ;;  %v1632_v1 = vmul.f32 %v2120_v63, %v1504_v55 }
 0x408   : > { %1759 = vst [vmem:[%s2928_s26 + $0x3f0] sm:$0xff] %v1631_v62  ;;  %1760 = vst [vmem:[%s2928_s26 + $0x3f8] sm:$0xff] %v1632_v1 }
 0x409   : > { %2162 = shalt.err (!%p2159_p10)
}
 0x40a   : > { %s2163_s28 = scalar_lea.hbm %s3187_s15, 16384  ;;  %s2167_s13 = scalar_lea.hbm %s3241_s5, 32768 }
 0x40b   : > { %p2164_p0 = scmp.ne.s32.totalorder %s3187_s15, %s2163_s28  ;;  %p2168_p1 = scmp.lt.s32.totalorder %s3187_s15, %s3241_s5 }
 0x40c   : > { %p2169_p3 = scmp.lt.s32.totalorder %s2167_s13, %s2163_s28 }
 0x40d   : > { %p2165_p2 = pnand %p2164_p0, %p3271_p12 }
 0x40e   : > { %p2170_p6 = por %p2169_p3, %p2168_p1 }
 0x40f   : > { %p2166_p9 = pneg %p2165_p2 }
 0x411   : > { %p2171_p11 = pnand %p2170_p6, %p2166_p9 }
 0x413   : > { %2174 = shalt.err (!%p2171_p11)
}
 0x414   : > { %s2221_s25 = smov 256   ;;  %s2222_s12 = smov 16  }
 0x415   : > { %1935 = dma.vmem_to_hbm [thread:$0]  (%p3271_p12), %s3189_s29, 16384, %s3187_s15, %s1762_s22, %s2221_s25, %s2221_s25, %s2222_s12  }
 0x416 PF: > { %s1791_s14 = sand.u32 1, %s2201_s18   ;;  %p3272_p13 = scmp.ne.s32.totalorder %s3252_s6, 0 }
 0x417   : > { %p3273_p4 = scmp.ge.s32.totalorder %s2213_s21, 2  ;;  %s1792_s16 = scalar_lea.sflag [#allocation4], %s1791_s14 }
 0x419   : > { %p1942_p5 = pnand %p3273_p4, %p3272_p13 }
 0x41b   : > { %p1943_p7 = pneg %p1942_p5 }
 0x41d   : > { %2196 = dma.done.wait (%p1943_p7), %s1792_s16, 16384  }
 0x41e   : > { %2198 = vsyncadd (%p1943_p7), %s1792_s16, 4294950912  ;;  %p18_p8 = scmp.ge.s32.totalorder %s2278_s24, 4   ;;  %s3274_s18 = smov %s2205_s19 }
 0x41f   : > { %s3275_s19 = smov %s2209_s20  ;;  %s3276_s20 = smov %s2290_s27 }
 0x420   : > { %s3277_s21 = smov %s2278_s24  ;;  %20 = sbr.rel (!%p18_p8) target bundleno = 5 (0x5), region = 85 }
 0x425   :  { %1797 = vsyncpa [#allocation3], 1 }
 0x426   :  { %1799 = vsyncpa [#allocation3 + $0x1], 1 }
 0x427   :  { %1800 = vsyncpa [#allocation4], 1 }
 0x428   :  { %1802 = vsyncpa [#allocation4 + $0x1], 1 }

</bundles_post_ra>
